<compile_context>
chip_gen: v7x
topology: tpu7x:2x2x1
jax: 0.10.0
libtpu: 0.0.40
codegen_flags: <defaults>
</compile_context>

<pallas_src>
import functools

import jax
import jax.numpy as jnp
from jax.experimental import pallas as pl
from jax.experimental.pallas import tpu as pltpu

START_TOKEN = 0


def _decoder_kernel(g_ref, whh_ref, bhh_ref, wout_ref, bout_ref, h0_ref,
                    logp_ref, hT_ref, *, T, H):
    """One batch block: full greedy decode of T steps.

    g_ref    : [Vp, 3H]  fused relu(embedding) @ w_ih + b_ih   (padded rows = 0)
    whh_ref  : [H, 3H]
    bhh_ref  : [1, 3H]
    wout_ref : [H, Vp]   (padded cols = 0)
    bout_ref : [1, Vp]   (padded lanes = -1e30)
    h0_ref   : [Bb, H]
    logp_ref : [Bb, T, Vp]  (batch-first, lane-dense)
    hT_ref   : [Bb, H]
    """
    Bb = h0_ref.shape[0]
    Vp = g_ref.shape[0]

    # Load everything once; hoist the iota out of the loop.
    h = h0_ref[...]
    g_tab = g_ref[...]
    whh = whh_ref[...]
    bhh = bhh_ref[...]
    wout = wout_ref[...]
    bout = bout_ref[...]

    col = jax.lax.broadcasted_iota(jnp.int32, (Bb, Vp), 1)          # [Bb, Vp]
    onehot = (col == START_TOKEN).astype(jnp.float32)               # START token

    # Static unroll over the (small, static) decode length: one kernel call,
    # no per-step grid overhead.  TODO(synk): switch to lax.fori_loop with a
    # [T, Bb, Vp] layout if T becomes large.
    for t in range(T):
        # fused embedding->relu->input-gate matmul (bias b_ih already baked in)
        gx = jnp.dot(onehot, g_tab, preferred_element_type=jnp.float32)   # [Bb,3H]
        gh = jnp.dot(h, whh, preferred_element_type=jnp.float32) + bhh    # [Bb,3H]

        r = jax.nn.sigmoid(gx[:, 0:H] + gh[:, 0:H])
        z = jax.nn.sigmoid(gx[:, H:2 * H] + gh[:, H:2 * H])
        n = jnp.tanh(gx[:, 2 * H:3 * H] + r * gh[:, 2 * H:3 * H])
        h = (1.0 - z) * n + z * h

        logits = jnp.dot(h, wout, preferred_element_type=jnp.float32) + bout  # [Bb,Vp]

        # log_softmax over vocab (padded lanes are ~-1e30 -> contribute 0)
        m = jnp.max(logits, axis=-1, keepdims=True)
        lse = jnp.log(jnp.sum(jnp.exp(logits - m), axis=-1, keepdims=True)) + m
        logp_ref[:, t, :] = logits - lse

        # greedy next token: argmax with lowest-index tie-break (== torch.topk(1))
        idx = jnp.min(jnp.where(logits >= m, col, Vp), axis=-1, keepdims=True)
        onehot = (col == idx).astype(jnp.float32)

    hT_ref[...] = h


def decoder_forward(embedding, w_ih, w_hh, b_ih, b_hh, w_out, b_out,
                    encoder_hidden, max_length):
    """Greedy decode.

    embedding:       [V, E]
    w_ih:            [E, 3H]   (gates stacked r|z|n along last dim)
    w_hh:            [H, 3H]
    b_ih, b_hh:      [1, 3H]
    w_out:           [H, V]
    b_out:           [1, V]
    encoder_hidden:  [1, B, H]  (num_layers=1, batch, hidden) as in PyTorch
    Returns (log_probs [B, T, V], decoder_hidden [1, B, H], None)
    """
    V, _E = embedding.shape
    H = w_hh.shape[0]
    h0 = encoder_hidden[0]                      # [B, H]
    B = h0.shape[0]
    T = max_length

    LANE, SUB = 128, 8
    Vp = ((V + LANE - 1) // LANE) * LANE        # lane-dense vocab
    Bp = ((B + SUB - 1) // SUB) * SUB           # sublane-dense batch
    BB = SUB                                    # batch block (one sublane tile)
    nb = Bp // BB

    # --- one-time algebraic fusion: relu(embedding) @ w_ih + b_ih -> [V, 3H] ---
    g_tab = jnp.maximum(embedding, 0.0) @ w_ih + b_ih
    g_tab = jnp.pad(g_tab, ((0, Vp - V), (0, 0)))                   # pad rows w/ 0

    w_out_p = jnp.pad(w_out, ((0, 0), (0, Vp - V)))                 # pad cols w/ 0
    # padded vocab lanes get a huge negative bias -> ignored by max/softmax/argmax
    b_out_p = jnp.pad(b_out, ((0, 0), (0, Vp - V)), constant_values=-1e30)
    h0_p = jnp.pad(h0, ((0, Bp - B), (0, 0)))                       # pad batch rows

    kernel = functools.partial(_decoder_kernel, T=T, H=H)

    logp, h_final = pl.pallas_call(
        kernel,
        out_shape=(
            jax.ShapeDtypeStruct((Bp, T, Vp), jnp.float32),   # batch-first log-probs
            jax.ShapeDtypeStruct((Bp, H), jnp.float32),       # final hidden
        ),
        grid_spec=pltpu.PrefetchScalarGridSpec(
            num_scalar_prefetch=0,
            grid=(nb,),                                       # batch blocks
            in_specs=[
                pl.BlockSpec((Vp, 3 * H), lambda b: (0, 0)),  # fused gate table
                pl.BlockSpec((H, 3 * H), lambda b: (0, 0)),   # w_hh
                pl.BlockSpec((1, 3 * H), lambda b: (0, 0)),   # b_hh
                pl.BlockSpec((H, Vp), lambda b: (0, 0)),      # w_out (padded)
                pl.BlockSpec((1, Vp), lambda b: (0, 0)),      # b_out (padded)
                pl.BlockSpec((BB, H), lambda b: (b, 0)),      # h0 (per batch block)
            ],
            out_specs=[
                pl.BlockSpec((BB, T, Vp), lambda b: (b, 0, 0)),
                pl.BlockSpec((BB, H), lambda b: (b, 0)),
            ],
        ),
        compiler_params=pltpu.CompilerParams(
            dimension_semantics=("parallel",),   # batch blocks are independent
        ),
    )(g_tab, w_hh, b_hh, w_out_p, b_out_p, h0_p)

    log_probs = logp[:B, :, :V]                 # already batch_first [B, T, V]
    decoder_hidden = h_final[None, :B, :]       # [1, B, H]
    return log_probs, decoder_hidden, None


if __name__ == "__main__":
    # ---- synthetic config (matches the nn.Module's __init__ shapes) ---------
    params = dict(
        hidden_layer_size=32,
        embedding_size=32,
        cell_type="GRU",
        num_layers=1,
        dropout=0.0,
        activation_fn="relu",
        max_length=8,
    )
    output_size = 16          # vocab size
    batch = 2
    H = params["hidden_layer_size"]
    E = params["embedding_size"]
    V = output_size
    T = params["max_length"]

    key = jax.random.PRNGKey(0)
    ks = jax.random.split(key, 9)
    scale = 0.1
    embedding = scale * jax.random.normal(ks[0], (V, E), jnp.float32)
    w_ih = scale * jax.random.normal(ks[1], (E, 3 * H), jnp.float32)
    w_hh = scale * jax.random.normal(ks[2], (H, 3 * H), jnp.float32)
    b_ih = scale * jax.random.normal(ks[3], (1, 3 * H), jnp.float32)
    b_hh = scale * jax.random.normal(ks[4], (1, 3 * H), jnp.float32)
    w_out = scale * jax.random.normal(ks[5], (H, V), jnp.float32)
    b_out = scale * jax.random.normal(ks[6], (1, V), jnp.float32)

    # encoder_outputs are unused by the PyTorch forward (no attention);
    # encoder_hidden is the GRU initial hidden state, shape (num_layers, B, H).
    encoder_hidden = scale * jax.random.normal(ks[7], (1, batch, H), jnp.float32)

    log_probs, dec_hidden, attn = jax.jit(
        decoder_forward, static_argnums=(8,)
    )(embedding, w_ih, w_hh, b_ih, b_hh, w_out, b_out, encoder_hidden, T)

    jax.block_until_ready((log_probs, dec_hidden))

    assert log_probs.shape == (batch, T, V)
    assert dec_hidden.shape == (1, batch, H)
    # log_softmax rows must sum to ~1 in prob space
    assert bool(jnp.allclose(jnp.sum(jnp.exp(log_probs), axis=-1), 1.0, atol=1e-4))
    assert attn is None

    print("KERNEL_OK")
</pallas_src>

<mosaic_0001>
module attributes {stable_mosaic.version = 11 : i64} {
  func.func @_decoder_kernel(%arg0: i32, %arg1: memref<128x96xf32, #tpu.memory_space<vmem>>, %arg2: memref<32x96xf32, #tpu.memory_space<vmem>>, %arg3: memref<1x96xf32, #tpu.memory_space<vmem>>, %arg4: memref<32x128xf32, #tpu.memory_space<vmem>>, %arg5: memref<1x128xf32, #tpu.memory_space<vmem>>, %arg6: memref<8x32xf32, #tpu.memory_space<vmem>>, %arg7: memref<8x8x128xf32, #tpu.memory_space<vmem>>, %arg8: memref<8x32xf32, #tpu.memory_space<vmem>>) attributes {dimension_semantics = [#tpu.dimension_semantics<parallel>], iteration_bounds = array<i64: 1>, scalar_prefetch = 0 : i64, scratch_operands = 0 : i64, tpu.core_type = #tpu.core_type<tc>, window_params = [{pipeline_mode = #tpu.pipeline_mode<synchronous>, transform_indices = @transform_0, window_bounds = array<i64: 128, 96>}, {pipeline_mode = #tpu.pipeline_mode<synchronous>, transform_indices = @transform_1, window_bounds = array<i64: 32, 96>}, {pipeline_mode = #tpu.pipeline_mode<synchronous>, transform_indices = @transform_2, window_bounds = array<i64: 1, 96>}, {pipeline_mode = #tpu.pipeline_mode<synchronous>, transform_indices = @transform_3, window_bounds = array<i64: 32, 128>}, {pipeline_mode = #tpu.pipeline_mode<synchronous>, transform_indices = @transform_4, window_bounds = array<i64: 1, 128>}, {transform_indices = @transform_5, window_bounds = array<i64: 8, 32>}, {transform_indices = @transform_6, window_bounds = array<i64: 8, 8, 128>}, {transform_indices = @transform_7, window_bounds = array<i64: 8, 32>}]} {
    %c0 = arith.constant 0 : index
    %c0_0 = arith.constant 0 : index
    %0 = vector.load %arg6[%c0, %c0_0] : memref<8x32xf32, #tpu.memory_space<vmem>>, vector<8x32xf32>
    %c0_1 = arith.constant 0 : index
    %c0_2 = arith.constant 0 : index
    %1 = vector.load %arg1[%c0_1, %c0_2] : memref<128x96xf32, #tpu.memory_space<vmem>>, vector<128x96xf32>
    %c0_3 = arith.constant 0 : index
    %c0_4 = arith.constant 0 : index
    %2 = vector.load %arg2[%c0_3, %c0_4] : memref<32x96xf32, #tpu.memory_space<vmem>>, vector<32x96xf32>
    %c0_5 = arith.constant 0 : index
    %c0_6 = arith.constant 0 : index
    %3 = vector.load %arg3[%c0_5, %c0_6] : memref<1x96xf32, #tpu.memory_space<vmem>>, vector<1x96xf32>
    %c0_7 = arith.constant 0 : index
    %c0_8 = arith.constant 0 : index
    %4 = vector.load %arg4[%c0_7, %c0_8] : memref<32x128xf32, #tpu.memory_space<vmem>>, vector<32x128xf32>
    %c0_9 = arith.constant 0 : index
    %c0_10 = arith.constant 0 : index
    %5 = vector.load %arg5[%c0_9, %c0_10] : memref<1x128xf32, #tpu.memory_space<vmem>>, vector<1x128xf32>
    %6 = tpu.iota {dimensions = array<i32: 1>} : vector<8x128xi32>
    %c0_i32 = arith.constant 0 : i32
    %7 = vector.broadcast %c0_i32 : i32 to vector<8x128xi32>
    %8 = arith.cmpi eq, %6, %7 : vector<8x128xi32>
    %9 = arith.extui %8 : vector<8x128xi1> to vector<8x128xi32>
    %10 = arith.sitofp %9 : vector<8x128xi32> to vector<8x128xf32>
    %cst = arith.constant dense<0.000000e+00> : vector<8x96xf32>
    %11 = tpu.matmul %10, %1, %cst {dimension_numbers = #tpu.dot_dimension_numbers<[1], [0], [0], [1], [0, 0, 1, 1], [], []>} : vector<8x128xf32>, vector<128x96xf32>, vector<8x96xf32> -> vector<8x96xf32>
    %cst_11 = arith.constant dense<0.000000e+00> : vector<8x96xf32>
    %12 = tpu.matmul %0, %2, %cst_11 {dimension_numbers = #tpu.dot_dimension_numbers<[1], [0], [0], [1], [0, 0, 1, 1], [], []>} : vector<8x32xf32>, vector<32x96xf32>, vector<8x96xf32> -> vector<8x96xf32>
    %13 = vector.broadcast %3 : vector<1x96xf32> to vector<8x96xf32>
    %14 = arith.addf %12, %13 : vector<8x96xf32>
    %15 = vector.extract_strided_slice %11 {offsets = [0, 0], sizes = [8, 32], strides = [1, 1]} : vector<8x96xf32> to vector<8x32xf32>
    %16 = vector.extract_strided_slice %14 {offsets = [0, 0], sizes = [8, 32], strides = [1, 1]} : vector<8x96xf32> to vector<8x32xf32>
    %17 = arith.addf %15, %16 : vector<8x32xf32>
    %18 = arith.negf %17 : vector<8x32xf32>
    %19 = math.exp %18 : vector<8x32xf32>
    %cst_12 = arith.constant 1.000000e+00 : f32
    %20 = vector.broadcast %cst_12 : f32 to vector<8x32xf32>
    %21 = arith.addf %20, %19 : vector<8x32xf32>
    %22 = arith.divf %20, %21 : vector<8x32xf32>
    %23 = vector.extract_strided_slice %11 {offsets = [0, 32], sizes = [8, 32], strides = [1, 1]} : vector<8x96xf32> to vector<8x32xf32>
    %24 = vector.extract_strided_slice %14 {offsets = [0, 32], sizes = [8, 32], strides = [1, 1]} : vector<8x96xf32> to vector<8x32xf32>
    %25 = arith.addf %23, %24 : vector<8x32xf32>
    %26 = arith.negf %25 : vector<8x32xf32>
    %27 = math.exp %26 : vector<8x32xf32>
    %cst_13 = arith.constant 1.000000e+00 : f32
    %28 = vector.broadcast %cst_13 : f32 to vector<8x32xf32>
    %29 = arith.addf %28, %27 : vector<8x32xf32>
    %30 = arith.divf %28, %29 : vector<8x32xf32>
    %31 = vector.extract_strided_slice %11 {offsets = [0, 64], sizes = [8, 32], strides = [1, 1]} : vector<8x96xf32> to vector<8x32xf32>
    %32 = vector.extract_strided_slice %14 {offsets = [0, 64], sizes = [8, 32], strides = [1, 1]} : vector<8x96xf32> to vector<8x32xf32>
    %33 = arith.mulf %22, %32 : vector<8x32xf32>
    %34 = arith.addf %31, %33 : vector<8x32xf32>
    %35 = math.tanh %34 : vector<8x32xf32>
    %cst_14 = arith.constant 1.000000e+00 : f32
    %36 = vector.broadcast %cst_14 : f32 to vector<8x32xf32>
    %37 = arith.subf %36, %30 : vector<8x32xf32>
    %38 = arith.mulf %37, %35 : vector<8x32xf32>
    %39 = arith.mulf %30, %0 : vector<8x32xf32>
    %40 = arith.addf %38, %39 : vector<8x32xf32>
    %cst_15 = arith.constant dense<0.000000e+00> : vector<8x128xf32>
    %41 = tpu.matmul %40, %4, %cst_15 {dimension_numbers = #tpu.dot_dimension_numbers<[1], [0], [0], [1], [0, 0, 1, 1], [], []>} : vector<8x32xf32>, vector<32x128xf32>, vector<8x128xf32> -> vector<8x128xf32>
    %42 = vector.broadcast %5 : vector<1x128xf32> to vector<8x128xf32>
    %43 = arith.addf %41, %42 : vector<8x128xf32>
    %cst_16 = arith.constant dense<0xFF800000> : vector<8xf32>
    %44 = vector.multi_reduction <maximumf>, %43, %cst_16 [1] : vector<8x128xf32> to vector<8xf32>
    %45 = vector.shape_cast %44 : vector<8xf32> to vector<8x1xf32>
    %46 = vector.broadcast %45 : vector<8x1xf32> to vector<8x128xf32>
    %47 = arith.subf %43, %46 : vector<8x128xf32>
    %48 = math.exp %47 : vector<8x128xf32>
    %cst_17 = arith.constant dense<0.000000e+00> : vector<8xf32>
    %49 = vector.multi_reduction <add>, %48, %cst_17 [1] : vector<8x128xf32> to vector<8xf32>
    %50 = vector.shape_cast %49 : vector<8xf32> to vector<8x1xf32>
    %51 = math.log %50 : vector<8x1xf32>
    %52 = arith.addf %51, %45 : vector<8x1xf32>
    %53 = vector.broadcast %52 : vector<8x1xf32> to vector<8x128xf32>
    %54 = arith.subf %43, %53 : vector<8x128xf32>
    %c0_18 = arith.constant 0 : index
    %c0_19 = arith.constant 0 : index
    %c0_20 = arith.constant 0 : index
    %55 = vector.load %arg7[%c0_18, %c0_19, %c0_20] : memref<8x8x128xf32, #tpu.memory_space<vmem>>, vector<8x1x128xf32>
    %56 = vector.shape_cast %55 : vector<8x1x128xf32> to vector<8x128xf32>
    %57 = vector.shape_cast %54 : vector<8x128xf32> to vector<8x1x128xf32>
    tpu.vector_store %arg7[%c0_18, %c0_19, %c0_20], %57 {strides = array<i32>} : memref<8x8x128xf32, #tpu.memory_space<vmem>>, vector<8x1x128xf32>,
    %58 = vector.broadcast %45 : vector<8x1xf32> to vector<8x128xf32>
    %59 = arith.cmpf oge, %43, %58 : vector<8x128xf32>
    %c128_i32 = arith.constant 128 : i32
    %60 = vector.broadcast %c128_i32 : i32 to vector<8x128xi32>
    %61 = arith.select %59, %6, %60 : vector<8x128xi1>, vector<8x128xi32>
    %cst_21 = arith.constant dense<2147483647> : vector<8xi32>
    %62 = vector.multi_reduction <minsi>, %61, %cst_21 [1] : vector<8x128xi32> to vector<8xi32>
    %63 = vector.shape_cast %62 : vector<8xi32> to vector<8x1xi32>
    %64 = vector.broadcast %63 : vector<8x1xi32> to vector<8x128xi32>
    %65 = arith.cmpi eq, %6, %64 : vector<8x128xi32>
    %66 = arith.extui %65 : vector<8x128xi1> to vector<8x128xi32>
    %67 = arith.sitofp %66 : vector<8x128xi32> to vector<8x128xf32>
    %cst_22 = arith.constant dense<0.000000e+00> : vector<8x96xf32>
    %68 = tpu.matmul %67, %1, %cst_22 {dimension_numbers = #tpu.dot_dimension_numbers<[1], [0], [0], [1], [0, 0, 1, 1], [], []>} : vector<8x128xf32>, vector<128x96xf32>, vector<8x96xf32> -> vector<8x96xf32>
    %cst_23 = arith.constant dense<0.000000e+00> : vector<8x96xf32>
    %69 = tpu.matmul %40, %2, %cst_23 {dimension_numbers = #tpu.dot_dimension_numbers<[1], [0], [0], [1], [0, 0, 1, 1], [], []>} : vector<8x32xf32>, vector<32x96xf32>, vector<8x96xf32> -> vector<8x96xf32>
    %70 = vector.broadcast %3 : vector<1x96xf32> to vector<8x96xf32>
    %71 = arith.addf %69, %70 : vector<8x96xf32>
    %72 = vector.extract_strided_slice %68 {offsets = [0, 0], sizes = [8, 32], strides = [1, 1]} : vector<8x96xf32> to vector<8x32xf32>
    %73 = vector.extract_strided_slice %71 {offsets = [0, 0], sizes = [8, 32], strides = [1, 1]} : vector<8x96xf32> to vector<8x32xf32>
    %74 = arith.addf %72, %73 : vector<8x32xf32>
    %75 = arith.negf %74 : vector<8x32xf32>
    %76 = math.exp %75 : vector<8x32xf32>
    %cst_24 = arith.constant 1.000000e+00 : f32
    %77 = vector.broadcast %cst_24 : f32 to vector<8x32xf32>
    %78 = arith.addf %77, %76 : vector<8x32xf32>
    %79 = arith.divf %77, %78 : vector<8x32xf32>
    %80 = vector.extract_strided_slice %68 {offsets = [0, 32], sizes = [8, 32], strides = [1, 1]} : vector<8x96xf32> to vector<8x32xf32>
    %81 = vector.extract_strided_slice %71 {offsets = [0, 32], sizes = [8, 32], strides = [1, 1]} : vector<8x96xf32> to vector<8x32xf32>
    %82 = arith.addf %80, %81 : vector<8x32xf32>
    %83 = arith.negf %82 : vector<8x32xf32>
    %84 = math.exp %83 : vector<8x32xf32>
    %cst_25 = arith.constant 1.000000e+00 : f32
    %85 = vector.broadcast %cst_25 : f32 to vector<8x32xf32>
    %86 = arith.addf %85, %84 : vector<8x32xf32>
    %87 = arith.divf %85, %86 : vector<8x32xf32>
    %88 = vector.extract_strided_slice %68 {offsets = [0, 64], sizes = [8, 32], strides = [1, 1]} : vector<8x96xf32> to vector<8x32xf32>
    %89 = vector.extract_strided_slice %71 {offsets = [0, 64], sizes = [8, 32], strides = [1, 1]} : vector<8x96xf32> to vector<8x32xf32>
    %90 = arith.mulf %79, %89 : vector<8x32xf32>
    %91 = arith.addf %88, %90 : vector<8x32xf32>
    %92 = math.tanh %91 : vector<8x32xf32>
    %cst_26 = arith.constant 1.000000e+00 : f32
    %93 = vector.broadcast %cst_26 : f32 to vector<8x32xf32>
    %94 = arith.subf %93, %87 : vector<8x32xf32>
    %95 = arith.mulf %94, %92 : vector<8x32xf32>
    %96 = arith.mulf %87, %40 : vector<8x32xf32>
    %97 = arith.addf %95, %96 : vector<8x32xf32>
    %cst_27 = arith.constant dense<0.000000e+00> : vector<8x128xf32>
    %98 = tpu.matmul %97, %4, %cst_27 {dimension_numbers = #tpu.dot_dimension_numbers<[1], [0], [0], [1], [0, 0, 1, 1], [], []>} : vector<8x32xf32>, vector<32x128xf32>, vector<8x128xf32> -> vector<8x128xf32>
    %99 = vector.broadcast %5 : vector<1x128xf32> to vector<8x128xf32>
    %100 = arith.addf %98, %99 : vector<8x128xf32>
    %cst_28 = arith.constant dense<0xFF800000> : vector<8xf32>
    %101 = vector.multi_reduction <maximumf>, %100, %cst_28 [1] : vector<8x128xf32> to vector<8xf32>
    %102 = vector.shape_cast %101 : vector<8xf32> to vector<8x1xf32>
    %103 = vector.broadcast %102 : vector<8x1xf32> to vector<8x128xf32>
    %104 = arith.subf %100, %103 : vector<8x128xf32>
    %105 = math.exp %104 : vector<8x128xf32>
    %cst_29 = arith.constant dense<0.000000e+00> : vector<8xf32>
    %106 = vector.multi_reduction <add>, %105, %cst_29 [1] : vector<8x128xf32> to vector<8xf32>
    %107 = vector.shape_cast %106 : vector<8xf32> to vector<8x1xf32>
    %108 = math.log %107 : vector<8x1xf32>
    %109 = arith.addf %108, %102 : vector<8x1xf32>
    %110 = vector.broadcast %109 : vector<8x1xf32> to vector<8x128xf32>
    %111 = arith.subf %100, %110 : vector<8x128xf32>
    %c0_30 = arith.constant 0 : index
    %c1 = arith.constant 1 : index
    %c0_31 = arith.constant 0 : index
    %112 = vector.load %arg7[%c0_30, %c1, %c0_31] : memref<8x8x128xf32, #tpu.memory_space<vmem>>, vector<8x1x128xf32>
    %113 = vector.shape_cast %112 : vector<8x1x128xf32> to vector<8x128xf32>
    %114 = vector.shape_cast %111 : vector<8x128xf32> to vector<8x1x128xf32>
    tpu.vector_store %arg7[%c0_30, %c1, %c0_31], %114 {strides = array<i32>} : memref<8x8x128xf32, #tpu.memory_space<vmem>>, vector<8x1x128xf32>,
    %115 = vector.broadcast %102 : vector<8x1xf32> to vector<8x128xf32>
    %116 = arith.cmpf oge, %100, %115 : vector<8x128xf32>
    %c128_i32_32 = arith.constant 128 : i32
    %117 = vector.broadcast %c128_i32_32 : i32 to vector<8x128xi32>
    %118 = arith.select %116, %6, %117 : vector<8x128xi1>, vector<8x128xi32>
    %cst_33 = arith.constant dense<2147483647> : vector<8xi32>
    %119 = vector.multi_reduction <minsi>, %118, %cst_33 [1] : vector<8x128xi32> to vector<8xi32>
    %120 = vector.shape_cast %119 : vector<8xi32> to vector<8x1xi32>
    %121 = vector.broadcast %120 : vector<8x1xi32> to vector<8x128xi32>
    %122 = arith.cmpi eq, %6, %121 : vector<8x128xi32>
    %123 = arith.extui %122 : vector<8x128xi1> to vector<8x128xi32>
    %124 = arith.sitofp %123 : vector<8x128xi32> to vector<8x128xf32>
    %cst_34 = arith.constant dense<0.000000e+00> : vector<8x96xf32>
    %125 = tpu.matmul %124, %1, %cst_34 {dimension_numbers = #tpu.dot_dimension_numbers<[1], [0], [0], [1], [0, 0, 1, 1], [], []>} : vector<8x128xf32>, vector<128x96xf32>, vector<8x96xf32> -> vector<8x96xf32>
    %cst_35 = arith.constant dense<0.000000e+00> : vector<8x96xf32>
    %126 = tpu.matmul %97, %2, %cst_35 {dimension_numbers = #tpu.dot_dimension_numbers<[1], [0], [0], [1], [0, 0, 1, 1], [], []>} : vector<8x32xf32>, vector<32x96xf32>, vector<8x96xf32> -> vector<8x96xf32>
    %127 = vector.broadcast %3 : vector<1x96xf32> to vector<8x96xf32>
    %128 = arith.addf %126, %127 : vector<8x96xf32>
    %129 = vector.extract_strided_slice %125 {offsets = [0, 0], sizes = [8, 32], strides = [1, 1]} : vector<8x96xf32> to vector<8x32xf32>
    %130 = vector.extract_strided_slice %128 {offsets = [0, 0], sizes = [8, 32], strides = [1, 1]} : vector<8x96xf32> to vector<8x32xf32>
    %131 = arith.addf %129, %130 : vector<8x32xf32>
    %132 = arith.negf %131 : vector<8x32xf32>
    %133 = math.exp %132 : vector<8x32xf32>
    %cst_36 = arith.constant 1.000000e+00 : f32
    %134 = vector.broadcast %cst_36 : f32 to vector<8x32xf32>
    %135 = arith.addf %134, %133 : vector<8x32xf32>
    %136 = arith.divf %134, %135 : vector<8x32xf32>
    %137 = vector.extract_strided_slice %125 {offsets = [0, 32], sizes = [8, 32], strides = [1, 1]} : vector<8x96xf32> to vector<8x32xf32>
    %138 = vector.extract_strided_slice %128 {offsets = [0, 32], sizes = [8, 32], strides = [1, 1]} : vector<8x96xf32> to vector<8x32xf32>
    %139 = arith.addf %137, %138 : vector<8x32xf32>
    %140 = arith.negf %139 : vector<8x32xf32>
    %141 = math.exp %140 : vector<8x32xf32>
    %cst_37 = arith.constant 1.000000e+00 : f32
    %142 = vector.broadcast %cst_37 : f32 to vector<8x32xf32>
    %143 = arith.addf %142, %141 : vector<8x32xf32>
    %144 = arith.divf %142, %143 : vector<8x32xf32>
    %145 = vector.extract_strided_slice %125 {offsets = [0, 64], sizes = [8, 32], strides = [1, 1]} : vector<8x96xf32> to vector<8x32xf32>
    %146 = vector.extract_strided_slice %128 {offsets = [0, 64], sizes = [8, 32], strides = [1, 1]} : vector<8x96xf32> to vector<8x32xf32>
    %147 = arith.mulf %136, %146 : vector<8x32xf32>
    %148 = arith.addf %145, %147 : vector<8x32xf32>
    %149 = math.tanh %148 : vector<8x32xf32>
    %cst_38 = arith.constant 1.000000e+00 : f32
    %150 = vector.broadcast %cst_38 : f32 to vector<8x32xf32>
    %151 = arith.subf %150, %144 : vector<8x32xf32>
    %152 = arith.mulf %151, %149 : vector<8x32xf32>
    %153 = arith.mulf %144, %97 : vector<8x32xf32>
    %154 = arith.addf %152, %153 : vector<8x32xf32>
    %cst_39 = arith.constant dense<0.000000e+00> : vector<8x128xf32>
    %155 = tpu.matmul %154, %4, %cst_39 {dimension_numbers = #tpu.dot_dimension_numbers<[1], [0], [0], [1], [0, 0, 1, 1], [], []>} : vector<8x32xf32>, vector<32x128xf32>, vector<8x128xf32> -> vector<8x128xf32>
    %156 = vector.broadcast %5 : vector<1x128xf32> to vector<8x128xf32>
    %157 = arith.addf %155, %156 : vector<8x128xf32>
    %cst_40 = arith.constant dense<0xFF800000> : vector<8xf32>
    %158 = vector.multi_reduction <maximumf>, %157, %cst_40 [1] : vector<8x128xf32> to vector<8xf32>
    %159 = vector.shape_cast %158 : vector<8xf32> to vector<8x1xf32>
    %160 = vector.broadcast %159 : vector<8x1xf32> to vector<8x128xf32>
    %161 = arith.subf %157, %160 : vector<8x128xf32>
    %162 = math.exp %161 : vector<8x128xf32>
    %cst_41 = arith.constant dense<0.000000e+00> : vector<8xf32>
    %163 = vector.multi_reduction <add>, %162, %cst_41 [1] : vector<8x128xf32> to vector<8xf32>
    %164 = vector.shape_cast %163 : vector<8xf32> to vector<8x1xf32>
    %165 = math.log %164 : vector<8x1xf32>
    %166 = arith.addf %165, %159 : vector<8x1xf32>
    %167 = vector.broadcast %166 : vector<8x1xf32> to vector<8x128xf32>
    %168 = arith.subf %157, %167 : vector<8x128xf32>
    %c0_42 = arith.constant 0 : index
    %c2 = arith.constant 2 : index
    %c0_43 = arith.constant 0 : index
    %169 = vector.load %arg7[%c0_42, %c2, %c0_43] : memref<8x8x128xf32, #tpu.memory_space<vmem>>, vector<8x1x128xf32>
    %170 = vector.shape_cast %169 : vector<8x1x128xf32> to vector<8x128xf32>
    %171 = vector.shape_cast %168 : vector<8x128xf32> to vector<8x1x128xf32>
    tpu.vector_store %arg7[%c0_42, %c2, %c0_43], %171 {strides = array<i32>} : memref<8x8x128xf32, #tpu.memory_space<vmem>>, vector<8x1x128xf32>,
    %172 = vector.broadcast %159 : vector<8x1xf32> to vector<8x128xf32>
    %173 = arith.cmpf oge, %157, %172 : vector<8x128xf32>
    %c128_i32_44 = arith.constant 128 : i32
    %174 = vector.broadcast %c128_i32_44 : i32 to vector<8x128xi32>
    %175 = arith.select %173, %6, %174 : vector<8x128xi1>, vector<8x128xi32>
    %cst_45 = arith.constant dense<2147483647> : vector<8xi32>
    %176 = vector.multi_reduction <minsi>, %175, %cst_45 [1] : vector<8x128xi32> to vector<8xi32>
    %177 = vector.shape_cast %176 : vector<8xi32> to vector<8x1xi32>
    %178 = vector.broadcast %177 : vector<8x1xi32> to vector<8x128xi32>
    %179 = arith.cmpi eq, %6, %178 : vector<8x128xi32>
    %180 = arith.extui %179 : vector<8x128xi1> to vector<8x128xi32>
    %181 = arith.sitofp %180 : vector<8x128xi32> to vector<8x128xf32>
    %cst_46 = arith.constant dense<0.000000e+00> : vector<8x96xf32>
    %182 = tpu.matmul %181, %1, %cst_46 {dimension_numbers = #tpu.dot_dimension_numbers<[1], [0], [0], [1], [0, 0, 1, 1], [], []>} : vector<8x128xf32>, vector<128x96xf32>, vector<8x96xf32> -> vector<8x96xf32>
    %cst_47 = arith.constant dense<0.000000e+00> : vector<8x96xf32>
    %183 = tpu.matmul %154, %2, %cst_47 {dimension_numbers = #tpu.dot_dimension_numbers<[1], [0], [0], [1], [0, 0, 1, 1], [], []>} : vector<8x32xf32>, vector<32x96xf32>, vector<8x96xf32> -> vector<8x96xf32>
    %184 = vector.broadcast %3 : vector<1x96xf32> to vector<8x96xf32>
    %185 = arith.addf %183, %184 : vector<8x96xf32>
    %186 = vector.extract_strided_slice %182 {offsets = [0, 0], sizes = [8, 32], strides = [1, 1]} : vector<8x96xf32> to vector<8x32xf32>
    %187 = vector.extract_strided_slice %185 {offsets = [0, 0], sizes = [8, 32], strides = [1, 1]} : vector<8x96xf32> to vector<8x32xf32>
    %188 = arith.addf %186, %187 : vector<8x32xf32>
    %189 = arith.negf %188 : vector<8x32xf32>
    %190 = math.exp %189 : vector<8x32xf32>
    %cst_48 = arith.constant 1.000000e+00 : f32
    %191 = vector.broadcast %cst_48 : f32 to vector<8x32xf32>
    %192 = arith.addf %191, %190 : vector<8x32xf32>
    %193 = arith.divf %191, %192 : vector<8x32xf32>
    %194 = vector.extract_strided_slice %182 {offsets = [0, 32], sizes = [8, 32], strides = [1, 1]} : vector<8x96xf32> to vector<8x32xf32>
    %195 = vector.extract_strided_slice %185 {offsets = [0, 32], sizes = [8, 32], strides = [1, 1]} : vector<8x96xf32> to vector<8x32xf32>
    %196 = arith.addf %194, %195 : vector<8x32xf32>
    %197 = arith.negf %196 : vector<8x32xf32>
    %198 = math.exp %197 : vector<8x32xf32>
    %cst_49 = arith.constant 1.000000e+00 : f32
    %199 = vector.broadcast %cst_49 : f32 to vector<8x32xf32>
    %200 = arith.addf %199, %198 : vector<8x32xf32>
    %201 = arith.divf %199, %200 : vector<8x32xf32>
    %202 = vector.extract_strided_slice %182 {offsets = [0, 64], sizes = [8, 32], strides = [1, 1]} : vector<8x96xf32> to vector<8x32xf32>
    %203 = vector.extract_strided_slice %185 {offsets = [0, 64], sizes = [8, 32], strides = [1, 1]} : vector<8x96xf32> to vector<8x32xf32>
    %204 = arith.mulf %193, %203 : vector<8x32xf32>
    %205 = arith.addf %202, %204 : vector<8x32xf32>
    %206 = math.tanh %205 : vector<8x32xf32>
    %cst_50 = arith.constant 1.000000e+00 : f32
    %207 = vector.broadcast %cst_50 : f32 to vector<8x32xf32>
    %208 = arith.subf %207, %201 : vector<8x32xf32>
    %209 = arith.mulf %208, %206 : vector<8x32xf32>
    %210 = arith.mulf %201, %154 : vector<8x32xf32>
    %211 = arith.addf %209, %210 : vector<8x32xf32>
    %cst_51 = arith.constant dense<0.000000e+00> : vector<8x128xf32>
    %212 = tpu.matmul %211, %4, %cst_51 {dimension_numbers = #tpu.dot_dimension_numbers<[1], [0], [0], [1], [0, 0, 1, 1], [], []>} : vector<8x32xf32>, vector<32x128xf32>, vector<8x128xf32> -> vector<8x128xf32>
    %213 = vector.broadcast %5 : vector<1x128xf32> to vector<8x128xf32>
    %214 = arith.addf %212, %213 : vector<8x128xf32>
    %cst_52 = arith.constant dense<0xFF800000> : vector<8xf32>
    %215 = vector.multi_reduction <maximumf>, %214, %cst_52 [1] : vector<8x128xf32> to vector<8xf32>
    %216 = vector.shape_cast %215 : vector<8xf32> to vector<8x1xf32>
    %217 = vector.broadcast %216 : vector<8x1xf32> to vector<8x128xf32>
    %218 = arith.subf %214, %217 : vector<8x128xf32>
    %219 = math.exp %218 : vector<8x128xf32>
    %cst_53 = arith.constant dense<0.000000e+00> : vector<8xf32>
    %220 = vector.multi_reduction <add>, %219, %cst_53 [1] : vector<8x128xf32> to vector<8xf32>
    %221 = vector.shape_cast %220 : vector<8xf32> to vector<8x1xf32>
    %222 = math.log %221 : vector<8x1xf32>
    %223 = arith.addf %222, %216 : vector<8x1xf32>
    %224 = vector.broadcast %223 : vector<8x1xf32> to vector<8x128xf32>
    %225 = arith.subf %214, %224 : vector<8x128xf32>
    %c0_54 = arith.constant 0 : index
    %c3 = arith.constant 3 : index
    %c0_55 = arith.constant 0 : index
    %226 = vector.load %arg7[%c0_54, %c3, %c0_55] : memref<8x8x128xf32, #tpu.memory_space<vmem>>, vector<8x1x128xf32>
    %227 = vector.shape_cast %226 : vector<8x1x128xf32> to vector<8x128xf32>
    %228 = vector.shape_cast %225 : vector<8x128xf32> to vector<8x1x128xf32>
    tpu.vector_store %arg7[%c0_54, %c3, %c0_55], %228 {strides = array<i32>} : memref<8x8x128xf32, #tpu.memory_space<vmem>>, vector<8x1x128xf32>,
    %229 = vector.broadcast %216 : vector<8x1xf32> to vector<8x128xf32>
    %230 = arith.cmpf oge, %214, %229 : vector<8x128xf32>
    %c128_i32_56 = arith.constant 128 : i32
    %231 = vector.broadcast %c128_i32_56 : i32 to vector<8x128xi32>
    %232 = arith.select %230, %6, %231 : vector<8x128xi1>, vector<8x128xi32>
    %cst_57 = arith.constant dense<2147483647> : vector<8xi32>
    %233 = vector.multi_reduction <minsi>, %232, %cst_57 [1] : vector<8x128xi32> to vector<8xi32>
    %234 = vector.shape_cast %233 : vector<8xi32> to vector<8x1xi32>
    %235 = vector.broadcast %234 : vector<8x1xi32> to vector<8x128xi32>
    %236 = arith.cmpi eq, %6, %235 : vector<8x128xi32>
    %237 = arith.extui %236 : vector<8x128xi1> to vector<8x128xi32>
    %238 = arith.sitofp %237 : vector<8x128xi32> to vector<8x128xf32>
    %cst_58 = arith.constant dense<0.000000e+00> : vector<8x96xf32>
    %239 = tpu.matmul %238, %1, %cst_58 {dimension_numbers = #tpu.dot_dimension_numbers<[1], [0], [0], [1], [0, 0, 1, 1], [], []>} : vector<8x128xf32>, vector<128x96xf32>, vector<8x96xf32> -> vector<8x96xf32>
    %cst_59 = arith.constant dense<0.000000e+00> : vector<8x96xf32>
    %240 = tpu.matmul %211, %2, %cst_59 {dimension_numbers = #tpu.dot_dimension_numbers<[1], [0], [0], [1], [0, 0, 1, 1], [], []>} : vector<8x32xf32>, vector<32x96xf32>, vector<8x96xf32> -> vector<8x96xf32>
    %241 = vector.broadcast %3 : vector<1x96xf32> to vector<8x96xf32>
    %242 = arith.addf %240, %241 : vector<8x96xf32>
    %243 = vector.extract_strided_slice %239 {offsets = [0, 0], sizes = [8, 32], strides = [1, 1]} : vector<8x96xf32> to vector<8x32xf32>
    %244 = vector.extract_strided_slice %242 {offsets = [0, 0], sizes = [8, 32], strides = [1, 1]} : vector<8x96xf32> to vector<8x32xf32>
    %245 = arith.addf %243, %244 : vector<8x32xf32>
    %246 = arith.negf %245 : vector<8x32xf32>
    %247 = math.exp %246 : vector<8x32xf32>
    %cst_60 = arith.constant 1.000000e+00 : f32
    %248 = vector.broadcast %cst_60 : f32 to vector<8x32xf32>
    %249 = arith.addf %248, %247 : vector<8x32xf32>
    %250 = arith.divf %248, %249 : vector<8x32xf32>
    %251 = vector.extract_strided_slice %239 {offsets = [0, 32], sizes = [8, 32], strides = [1, 1]} : vector<8x96xf32> to vector<8x32xf32>
    %252 = vector.extract_strided_slice %242 {offsets = [0, 32], sizes = [8, 32], strides = [1, 1]} : vector<8x96xf32> to vector<8x32xf32>
    %253 = arith.addf %251, %252 : vector<8x32xf32>
    %254 = arith.negf %253 : vector<8x32xf32>
    %255 = math.exp %254 : vector<8x32xf32>
    %cst_61 = arith.constant 1.000000e+00 : f32
    %256 = vector.broadcast %cst_61 : f32 to vector<8x32xf32>
    %257 = arith.addf %256, %255 : vector<8x32xf32>
    %258 = arith.divf %256, %257 : vector<8x32xf32>
    %259 = vector.extract_strided_slice %239 {offsets = [0, 64], sizes = [8, 32], strides = [1, 1]} : vector<8x96xf32> to vector<8x32xf32>
    %260 = vector.extract_strided_slice %242 {offsets = [0, 64], sizes = [8, 32], strides = [1, 1]} : vector<8x96xf32> to vector<8x32xf32>
    %261 = arith.mulf %250, %260 : vector<8x32xf32>
    %262 = arith.addf %259, %261 : vector<8x32xf32>
    %263 = math.tanh %262 : vector<8x32xf32>
    %cst_62 = arith.constant 1.000000e+00 : f32
    %264 = vector.broadcast %cst_62 : f32 to vector<8x32xf32>
    %265 = arith.subf %264, %258 : vector<8x32xf32>
    %266 = arith.mulf %265, %263 : vector<8x32xf32>
    %267 = arith.mulf %258, %211 : vector<8x32xf32>
    %268 = arith.addf %266, %267 : vector<8x32xf32>
    %cst_63 = arith.constant dense<0.000000e+00> : vector<8x128xf32>
    %269 = tpu.matmul %268, %4, %cst_63 {dimension_numbers = #tpu.dot_dimension_numbers<[1], [0], [0], [1], [0, 0, 1, 1], [], []>} : vector<8x32xf32>, vector<32x128xf32>, vector<8x128xf32> -> vector<8x128xf32>
    %270 = vector.broadcast %5 : vector<1x128xf32> to vector<8x128xf32>
    %271 = arith.addf %269, %270 : vector<8x128xf32>
    %cst_64 = arith.constant dense<0xFF800000> : vector<8xf32>
    %272 = vector.multi_reduction <maximumf>, %271, %cst_64 [1] : vector<8x128xf32> to vector<8xf32>
    %273 = vector.shape_cast %272 : vector<8xf32> to vector<8x1xf32>
    %274 = vector.broadcast %273 : vector<8x1xf32> to vector<8x128xf32>
    %275 = arith.subf %271, %274 : vector<8x128xf32>
    %276 = math.exp %275 : vector<8x128xf32>
    %cst_65 = arith.constant dense<0.000000e+00> : vector<8xf32>
    %277 = vector.multi_reduction <add>, %276, %cst_65 [1] : vector<8x128xf32> to vector<8xf32>
    %278 = vector.shape_cast %277 : vector<8xf32> to vector<8x1xf32>
    %279 = math.log %278 : vector<8x1xf32>
    %280 = arith.addf %279, %273 : vector<8x1xf32>
    %281 = vector.broadcast %280 : vector<8x1xf32> to vector<8x128xf32>
    %282 = arith.subf %271, %281 : vector<8x128xf32>
    %c0_66 = arith.constant 0 : index
    %c4 = arith.constant 4 : index
    %c0_67 = arith.constant 0 : index
    %283 = vector.load %arg7[%c0_66, %c4, %c0_67] : memref<8x8x128xf32, #tpu.memory_space<vmem>>, vector<8x1x128xf32>
    %284 = vector.shape_cast %283 : vector<8x1x128xf32> to vector<8x128xf32>
    %285 = vector.shape_cast %282 : vector<8x128xf32> to vector<8x1x128xf32>
    tpu.vector_store %arg7[%c0_66, %c4, %c0_67], %285 {strides = array<i32>} : memref<8x8x128xf32, #tpu.memory_space<vmem>>, vector<8x1x128xf32>,
    %286 = vector.broadcast %273 : vector<8x1xf32> to vector<8x128xf32>
    %287 = arith.cmpf oge, %271, %286 : vector<8x128xf32>
    %c128_i32_68 = arith.constant 128 : i32
    %288 = vector.broadcast %c128_i32_68 : i32 to vector<8x128xi32>
    %289 = arith.select %287, %6, %288 : vector<8x128xi1>, vector<8x128xi32>
    %cst_69 = arith.constant dense<2147483647> : vector<8xi32>
    %290 = vector.multi_reduction <minsi>, %289, %cst_69 [1] : vector<8x128xi32> to vector<8xi32>
    %291 = vector.shape_cast %290 : vector<8xi32> to vector<8x1xi32>
    %292 = vector.broadcast %291 : vector<8x1xi32> to vector<8x128xi32>
    %293 = arith.cmpi eq, %6, %292 : vector<8x128xi32>
    %294 = arith.extui %293 : vector<8x128xi1> to vector<8x128xi32>
    %295 = arith.sitofp %294 : vector<8x128xi32> to vector<8x128xf32>
    %cst_70 = arith.constant dense<0.000000e+00> : vector<8x96xf32>
    %296 = tpu.matmul %295, %1, %cst_70 {dimension_numbers = #tpu.dot_dimension_numbers<[1], [0], [0], [1], [0, 0, 1, 1], [], []>} : vector<8x128xf32>, vector<128x96xf32>, vector<8x96xf32> -> vector<8x96xf32>
    %cst_71 = arith.constant dense<0.000000e+00> : vector<8x96xf32>
    %297 = tpu.matmul %268, %2, %cst_71 {dimension_numbers = #tpu.dot_dimension_numbers<[1], [0], [0], [1], [0, 0, 1, 1], [], []>} : vector<8x32xf32>, vector<32x96xf32>, vector<8x96xf32> -> vector<8x96xf32>
    %298 = vector.broadcast %3 : vector<1x96xf32> to vector<8x96xf32>
    %299 = arith.addf %297, %298 : vector<8x96xf32>
    %300 = vector.extract_strided_slice %296 {offsets = [0, 0], sizes = [8, 32], strides = [1, 1]} : vector<8x96xf32> to vector<8x32xf32>
    %301 = vector.extract_strided_slice %299 {offsets = [0, 0], sizes = [8, 32], strides = [1, 1]} : vector<8x96xf32> to vector<8x32xf32>
    %302 = arith.addf %300, %301 : vector<8x32xf32>
    %303 = arith.negf %302 : vector<8x32xf32>
    %304 = math.exp %303 : vector<8x32xf32>
    %cst_72 = arith.constant 1.000000e+00 : f32
    %305 = vector.broadcast %cst_72 : f32 to vector<8x32xf32>
    %306 = arith.addf %305, %304 : vector<8x32xf32>
    %307 = arith.divf %305, %306 : vector<8x32xf32>
    %308 = vector.extract_strided_slice %296 {offsets = [0, 32], sizes = [8, 32], strides = [1, 1]} : vector<8x96xf32> to vector<8x32xf32>
    %309 = vector.extract_strided_slice %299 {offsets = [0, 32], sizes = [8, 32], strides = [1, 1]} : vector<8x96xf32> to vector<8x32xf32>
    %310 = arith.addf %308, %309 : vector<8x32xf32>
    %311 = arith.negf %310 : vector<8x32xf32>
    %312 = math.exp %311 : vector<8x32xf32>
    %cst_73 = arith.constant 1.000000e+00 : f32
    %313 = vector.broadcast %cst_73 : f32 to vector<8x32xf32>
    %314 = arith.addf %313, %312 : vector<8x32xf32>
    %315 = arith.divf %313, %314 : vector<8x32xf32>
    %316 = vector.extract_strided_slice %296 {offsets = [0, 64], sizes = [8, 32], strides = [1, 1]} : vector<8x96xf32> to vector<8x32xf32>
    %317 = vector.extract_strided_slice %299 {offsets = [0, 64], sizes = [8, 32], strides = [1, 1]} : vector<8x96xf32> to vector<8x32xf32>
    %318 = arith.mulf %307, %317 : vector<8x32xf32>
    %319 = arith.addf %316, %318 : vector<8x32xf32>
    %320 = math.tanh %319 : vector<8x32xf32>
    %cst_74 = arith.constant 1.000000e+00 : f32
    %321 = vector.broadcast %cst_74 : f32 to vector<8x32xf32>
    %322 = arith.subf %321, %315 : vector<8x32xf32>
    %323 = arith.mulf %322, %320 : vector<8x32xf32>
    %324 = arith.mulf %315, %268 : vector<8x32xf32>
    %325 = arith.addf %323, %324 : vector<8x32xf32>
    %cst_75 = arith.constant dense<0.000000e+00> : vector<8x128xf32>
    %326 = tpu.matmul %325, %4, %cst_75 {dimension_numbers = #tpu.dot_dimension_numbers<[1], [0], [0], [1], [0, 0, 1, 1], [], []>} : vector<8x32xf32>, vector<32x128xf32>, vector<8x128xf32> -> vector<8x128xf32>
    %327 = vector.broadcast %5 : vector<1x128xf32> to vector<8x128xf32>
    %328 = arith.addf %326, %327 : vector<8x128xf32>
    %cst_76 = arith.constant dense<0xFF800000> : vector<8xf32>
    %329 = vector.multi_reduction <maximumf>, %328, %cst_76 [1] : vector<8x128xf32> to vector<8xf32>
    %330 = vector.shape_cast %329 : vector<8xf32> to vector<8x1xf32>
    %331 = vector.broadcast %330 : vector<8x1xf32> to vector<8x128xf32>
    %332 = arith.subf %328, %331 : vector<8x128xf32>
    %333 = math.exp %332 : vector<8x128xf32>
    %cst_77 = arith.constant dense<0.000000e+00> : vector<8xf32>
    %334 = vector.multi_reduction <add>, %333, %cst_77 [1] : vector<8x128xf32> to vector<8xf32>
    %335 = vector.shape_cast %334 : vector<8xf32> to vector<8x1xf32>
    %336 = math.log %335 : vector<8x1xf32>
    %337 = arith.addf %336, %330 : vector<8x1xf32>
    %338 = vector.broadcast %337 : vector<8x1xf32> to vector<8x128xf32>
    %339 = arith.subf %328, %338 : vector<8x128xf32>
    %c0_78 = arith.constant 0 : index
    %c5 = arith.constant 5 : index
    %c0_79 = arith.constant 0 : index
    %340 = vector.load %arg7[%c0_78, %c5, %c0_79] : memref<8x8x128xf32, #tpu.memory_space<vmem>>, vector<8x1x128xf32>
    %341 = vector.shape_cast %340 : vector<8x1x128xf32> to vector<8x128xf32>
    %342 = vector.shape_cast %339 : vector<8x128xf32> to vector<8x1x128xf32>
    tpu.vector_store %arg7[%c0_78, %c5, %c0_79], %342 {strides = array<i32>} : memref<8x8x128xf32, #tpu.memory_space<vmem>>, vector<8x1x128xf32>,
    %343 = vector.broadcast %330 : vector<8x1xf32> to vector<8x128xf32>
    %344 = arith.cmpf oge, %328, %343 : vector<8x128xf32>
    %c128_i32_80 = arith.constant 128 : i32
    %345 = vector.broadcast %c128_i32_80 : i32 to vector<8x128xi32>
    %346 = arith.select %344, %6, %345 : vector<8x128xi1>, vector<8x128xi32>
    %cst_81 = arith.constant dense<2147483647> : vector<8xi32>
    %347 = vector.multi_reduction <minsi>, %346, %cst_81 [1] : vector<8x128xi32> to vector<8xi32>
    %348 = vector.shape_cast %347 : vector<8xi32> to vector<8x1xi32>
    %349 = vector.broadcast %348 : vector<8x1xi32> to vector<8x128xi32>
    %350 = arith.cmpi eq, %6, %349 : vector<8x128xi32>
    %351 = arith.extui %350 : vector<8x128xi1> to vector<8x128xi32>
    %352 = arith.sitofp %351 : vector<8x128xi32> to vector<8x128xf32>
    %cst_82 = arith.constant dense<0.000000e+00> : vector<8x96xf32>
    %353 = tpu.matmul %352, %1, %cst_82 {dimension_numbers = #tpu.dot_dimension_numbers<[1], [0], [0], [1], [0, 0, 1, 1], [], []>} : vector<8x128xf32>, vector<128x96xf32>, vector<8x96xf32> -> vector<8x96xf32>
    %cst_83 = arith.constant dense<0.000000e+00> : vector<8x96xf32>
    %354 = tpu.matmul %325, %2, %cst_83 {dimension_numbers = #tpu.dot_dimension_numbers<[1], [0], [0], [1], [0, 0, 1, 1], [], []>} : vector<8x32xf32>, vector<32x96xf32>, vector<8x96xf32> -> vector<8x96xf32>
    %355 = vector.broadcast %3 : vector<1x96xf32> to vector<8x96xf32>
    %356 = arith.addf %354, %355 : vector<8x96xf32>
    %357 = vector.extract_strided_slice %353 {offsets = [0, 0], sizes = [8, 32], strides = [1, 1]} : vector<8x96xf32> to vector<8x32xf32>
    %358 = vector.extract_strided_slice %356 {offsets = [0, 0], sizes = [8, 32], strides = [1, 1]} : vector<8x96xf32> to vector<8x32xf32>
    %359 = arith.addf %357, %358 : vector<8x32xf32>
    %360 = arith.negf %359 : vector<8x32xf32>
    %361 = math.exp %360 : vector<8x32xf32>
    %cst_84 = arith.constant 1.000000e+00 : f32
    %362 = vector.broadcast %cst_84 : f32 to vector<8x32xf32>
    %363 = arith.addf %362, %361 : vector<8x32xf32>
    %364 = arith.divf %362, %363 : vector<8x32xf32>
    %365 = vector.extract_strided_slice %353 {offsets = [0, 32], sizes = [8, 32], strides = [1, 1]} : vector<8x96xf32> to vector<8x32xf32>
    %366 = vector.extract_strided_slice %356 {offsets = [0, 32], sizes = [8, 32], strides = [1, 1]} : vector<8x96xf32> to vector<8x32xf32>
    %367 = arith.addf %365, %366 : vector<8x32xf32>
    %368 = arith.negf %367 : vector<8x32xf32>
    %369 = math.exp %368 : vector<8x32xf32>
    %cst_85 = arith.constant 1.000000e+00 : f32
    %370 = vector.broadcast %cst_85 : f32 to vector<8x32xf32>
    %371 = arith.addf %370, %369 : vector<8x32xf32>
    %372 = arith.divf %370, %371 : vector<8x32xf32>
    %373 = vector.extract_strided_slice %353 {offsets = [0, 64], sizes = [8, 32], strides = [1, 1]} : vector<8x96xf32> to vector<8x32xf32>
    %374 = vector.extract_strided_slice %356 {offsets = [0, 64], sizes = [8, 32], strides = [1, 1]} : vector<8x96xf32> to vector<8x32xf32>
    %375 = arith.mulf %364, %374 : vector<8x32xf32>
    %376 = arith.addf %373, %375 : vector<8x32xf32>
    %377 = math.tanh %376 : vector<8x32xf32>
    %cst_86 = arith.constant 1.000000e+00 : f32
    %378 = vector.broadcast %cst_86 : f32 to vector<8x32xf32>
    %379 = arith.subf %378, %372 : vector<8x32xf32>
    %380 = arith.mulf %379, %377 : vector<8x32xf32>
    %381 = arith.mulf %372, %325 : vector<8x32xf32>
    %382 = arith.addf %380, %381 : vector<8x32xf32>
    %cst_87 = arith.constant dense<0.000000e+00> : vector<8x128xf32>
    %383 = tpu.matmul %382, %4, %cst_87 {dimension_numbers = #tpu.dot_dimension_numbers<[1], [0], [0], [1], [0, 0, 1, 1], [], []>} : vector<8x32xf32>, vector<32x128xf32>, vector<8x128xf32> -> vector<8x128xf32>
    %384 = vector.broadcast %5 : vector<1x128xf32> to vector<8x128xf32>
    %385 = arith.addf %383, %384 : vector<8x128xf32>
    %cst_88 = arith.constant dense<0xFF800000> : vector<8xf32>
    %386 = vector.multi_reduction <maximumf>, %385, %cst_88 [1] : vector<8x128xf32> to vector<8xf32>
    %387 = vector.shape_cast %386 : vector<8xf32> to vector<8x1xf32>
    %388 = vector.broadcast %387 : vector<8x1xf32> to vector<8x128xf32>
    %389 = arith.subf %385, %388 : vector<8x128xf32>
    %390 = math.exp %389 : vector<8x128xf32>
    %cst_89 = arith.constant dense<0.000000e+00> : vector<8xf32>
    %391 = vector.multi_reduction <add>, %390, %cst_89 [1] : vector<8x128xf32> to vector<8xf32>
    %392 = vector.shape_cast %391 : vector<8xf32> to vector<8x1xf32>
    %393 = math.log %392 : vector<8x1xf32>
    %394 = arith.addf %393, %387 : vector<8x1xf32>
    %395 = vector.broadcast %394 : vector<8x1xf32> to vector<8x128xf32>
    %396 = arith.subf %385, %395 : vector<8x128xf32>
    %c0_90 = arith.constant 0 : index
    %c6 = arith.constant 6 : index
    %c0_91 = arith.constant 0 : index
    %397 = vector.load %arg7[%c0_90, %c6, %c0_91] : memref<8x8x128xf32, #tpu.memory_space<vmem>>, vector<8x1x128xf32>
    %398 = vector.shape_cast %397 : vector<8x1x128xf32> to vector<8x128xf32>
    %399 = vector.shape_cast %396 : vector<8x128xf32> to vector<8x1x128xf32>
    tpu.vector_store %arg7[%c0_90, %c6, %c0_91], %399 {strides = array<i32>} : memref<8x8x128xf32, #tpu.memory_space<vmem>>, vector<8x1x128xf32>,
    %400 = vector.broadcast %387 : vector<8x1xf32> to vector<8x128xf32>
    %401 = arith.cmpf oge, %385, %400 : vector<8x128xf32>
    %c128_i32_92 = arith.constant 128 : i32
    %402 = vector.broadcast %c128_i32_92 : i32 to vector<8x128xi32>
    %403 = arith.select %401, %6, %402 : vector<8x128xi1>, vector<8x128xi32>
    %cst_93 = arith.constant dense<2147483647> : vector<8xi32>
    %404 = vector.multi_reduction <minsi>, %403, %cst_93 [1] : vector<8x128xi32> to vector<8xi32>
    %405 = vector.shape_cast %404 : vector<8xi32> to vector<8x1xi32>
    %406 = vector.broadcast %405 : vector<8x1xi32> to vector<8x128xi32>
    %407 = arith.cmpi eq, %6, %406 : vector<8x128xi32>
    %408 = arith.extui %407 : vector<8x128xi1> to vector<8x128xi32>
    %409 = arith.sitofp %408 : vector<8x128xi32> to vector<8x128xf32>
    %cst_94 = arith.constant dense<0.000000e+00> : vector<8x96xf32>
    %410 = tpu.matmul %409, %1, %cst_94 {dimension_numbers = #tpu.dot_dimension_numbers<[1], [0], [0], [1], [0, 0, 1, 1], [], []>} : vector<8x128xf32>, vector<128x96xf32>, vector<8x96xf32> -> vector<8x96xf32>
    %cst_95 = arith.constant dense<0.000000e+00> : vector<8x96xf32>
    %411 = tpu.matmul %382, %2, %cst_95 {dimension_numbers = #tpu.dot_dimension_numbers<[1], [0], [0], [1], [0, 0, 1, 1], [], []>} : vector<8x32xf32>, vector<32x96xf32>, vector<8x96xf32> -> vector<8x96xf32>
    %412 = vector.broadcast %3 : vector<1x96xf32> to vector<8x96xf32>
    %413 = arith.addf %411, %412 : vector<8x96xf32>
    %414 = vector.extract_strided_slice %410 {offsets = [0, 0], sizes = [8, 32], strides = [1, 1]} : vector<8x96xf32> to vector<8x32xf32>
    %415 = vector.extract_strided_slice %413 {offsets = [0, 0], sizes = [8, 32], strides = [1, 1]} : vector<8x96xf32> to vector<8x32xf32>
    %416 = arith.addf %414, %415 : vector<8x32xf32>
    %417 = arith.negf %416 : vector<8x32xf32>
    %418 = math.exp %417 : vector<8x32xf32>
    %cst_96 = arith.constant 1.000000e+00 : f32
    %419 = vector.broadcast %cst_96 : f32 to vector<8x32xf32>
    %420 = arith.addf %419, %418 : vector<8x32xf32>
    %421 = arith.divf %419, %420 : vector<8x32xf32>
    %422 = vector.extract_strided_slice %410 {offsets = [0, 32], sizes = [8, 32], strides = [1, 1]} : vector<8x96xf32> to vector<8x32xf32>
    %423 = vector.extract_strided_slice %413 {offsets = [0, 32], sizes = [8, 32], strides = [1, 1]} : vector<8x96xf32> to vector<8x32xf32>
    %424 = arith.addf %422, %423 : vector<8x32xf32>
    %425 = arith.negf %424 : vector<8x32xf32>
    %426 = math.exp %425 : vector<8x32xf32>
    %cst_97 = arith.constant 1.000000e+00 : f32
    %427 = vector.broadcast %cst_97 : f32 to vector<8x32xf32>
    %428 = arith.addf %427, %426 : vector<8x32xf32>
    %429 = arith.divf %427, %428 : vector<8x32xf32>
    %430 = vector.extract_strided_slice %410 {offsets = [0, 64], sizes = [8, 32], strides = [1, 1]} : vector<8x96xf32> to vector<8x32xf32>
    %431 = vector.extract_strided_slice %413 {offsets = [0, 64], sizes = [8, 32], strides = [1, 1]} : vector<8x96xf32> to vector<8x32xf32>
    %432 = arith.mulf %421, %431 : vector<8x32xf32>
    %433 = arith.addf %430, %432 : vector<8x32xf32>
    %434 = math.tanh %433 : vector<8x32xf32>
    %cst_98 = arith.constant 1.000000e+00 : f32
    %435 = vector.broadcast %cst_98 : f32 to vector<8x32xf32>
    %436 = arith.subf %435, %429 : vector<8x32xf32>
    %437 = arith.mulf %436, %434 : vector<8x32xf32>
    %438 = arith.mulf %429, %382 : vector<8x32xf32>
    %439 = arith.addf %437, %438 : vector<8x32xf32>
    %cst_99 = arith.constant dense<0.000000e+00> : vector<8x128xf32>
    %440 = tpu.matmul %439, %4, %cst_99 {dimension_numbers = #tpu.dot_dimension_numbers<[1], [0], [0], [1], [0, 0, 1, 1], [], []>} : vector<8x32xf32>, vector<32x128xf32>, vector<8x128xf32> -> vector<8x128xf32>
    %441 = vector.broadcast %5 : vector<1x128xf32> to vector<8x128xf32>
    %442 = arith.addf %440, %441 : vector<8x128xf32>
    %cst_100 = arith.constant dense<0xFF800000> : vector<8xf32>
    %443 = vector.multi_reduction <maximumf>, %442, %cst_100 [1] : vector<8x128xf32> to vector<8xf32>
    %444 = vector.shape_cast %443 : vector<8xf32> to vector<8x1xf32>
    %445 = vector.broadcast %444 : vector<8x1xf32> to vector<8x128xf32>
    %446 = arith.subf %442, %445 : vector<8x128xf32>
    %447 = math.exp %446 : vector<8x128xf32>
    %cst_101 = arith.constant dense<0.000000e+00> : vector<8xf32>
    %448 = vector.multi_reduction <add>, %447, %cst_101 [1] : vector<8x128xf32> to vector<8xf32>
    %449 = vector.shape_cast %448 : vector<8xf32> to vector<8x1xf32>
    %450 = math.log %449 : vector<8x1xf32>
    %451 = arith.addf %450, %444 : vector<8x1xf32>
    %452 = vector.broadcast %451 : vector<8x1xf32> to vector<8x128xf32>
    %453 = arith.subf %442, %452 : vector<8x128xf32>
    %c0_102 = arith.constant 0 : index
    %c7 = arith.constant 7 : index
    %c0_103 = arith.constant 0 : index
    %454 = vector.load %arg7[%c0_102, %c7, %c0_103] : memref<8x8x128xf32, #tpu.memory_space<vmem>>, vector<8x1x128xf32>
    %455 = vector.shape_cast %454 : vector<8x1x128xf32> to vector<8x128xf32>
    %456 = vector.shape_cast %453 : vector<8x128xf32> to vector<8x1x128xf32>
    tpu.vector_store %arg7[%c0_102, %c7, %c0_103], %456 {strides = array<i32>} : memref<8x8x128xf32, #tpu.memory_space<vmem>>, vector<8x1x128xf32>,
    %c0_104 = arith.constant 0 : index
    %c0_105 = arith.constant 0 : index
    %457 = vector.load %arg8[%c0_104, %c0_105] : memref<8x32xf32, #tpu.memory_space<vmem>>, vector<8x32xf32>
    tpu.vector_store %arg8[%c0_104, %c0_105], %439 {strides = array<i32>} : memref<8x32xf32, #tpu.memory_space<vmem>>, vector<8x32xf32>,
    return
  }
  func.func @transform_0(%arg0: i32) -> (i32, i32) {
    %c0_i32 = arith.constant 0 : i32
    %c0_i32_0 = arith.constant 0 : i32
    %c0_i32_1 = arith.constant 0 : i32
    return %c0_i32, %c0_i32_0 : i32, i32
  }
  func.func @transform_1(%arg0: i32) -> (i32, i32) {
    %c0_i32 = arith.constant 0 : i32
    %c0_i32_0 = arith.constant 0 : i32
    %c0_i32_1 = arith.constant 0 : i32
    return %c0_i32, %c0_i32_0 : i32, i32
  }
  func.func @transform_2(%arg0: i32) -> (i32, i32) {
    %c0_i32 = arith.constant 0 : i32
    %c0_i32_0 = arith.constant 0 : i32
    %c0_i32_1 = arith.constant 0 : i32
    return %c0_i32, %c0_i32_0 : i32, i32
  }
  func.func @transform_3(%arg0: i32) -> (i32, i32) {
    %c0_i32 = arith.constant 0 : i32
    %c0_i32_0 = arith.constant 0 : i32
    %c0_i32_1 = arith.constant 0 : i32
    return %c0_i32, %c0_i32_0 : i32, i32
  }
  func.func @transform_4(%arg0: i32) -> (i32, i32) {
    %c0_i32 = arith.constant 0 : i32
    %c0_i32_0 = arith.constant 0 : i32
    %c0_i32_1 = arith.constant 0 : i32
    return %c0_i32, %c0_i32_0 : i32, i32
  }
  func.func @transform_5(%arg0: i32) -> (i32, i32) {
    %c0_i32 = arith.constant 0 : i32
    %c0_i32_0 = arith.constant 0 : i32
    return %arg0, %c0_i32 : i32, i32
  }
  func.func @transform_6(%arg0: i32) -> (i32, i32, i32) {
    %c0_i32 = arith.constant 0 : i32
    %c0_i32_0 = arith.constant 0 : i32
    %c0_i32_1 = arith.constant 0 : i32
    return %arg0, %c0_i32, %c0_i32_0 : i32, i32, i32
  }
  func.func @transform_7(%arg0: i32) -> (i32, i32) {
    %c0_i32 = arith.constant 0 : i32
    %c0_i32_0 = arith.constant 0 : i32
    return %arg0, %c0_i32 : i32, i32
  }
}

</mosaic_0001>

<bundles_post_ra>
// kernel: decoder_forward.1
= control target key start
LH: loop header
LB: loop body
LE: loop exit
PB: predicated region body
PF: predicated region fallthrough
CT: control target
= control target key end

     0   :  { %v3887_v0 = vmov 0.0|0.0   ;;  %vm3888_vm0 = vmmov 0   ;;  %v3889_v8 = vmov 0.0   ;;  %vm133_vm1 = vcmask 261120   ;;  %s3891_s19 = smov 64   ;;  %s3892_s26 = smov 96   ;;  %s4743_s0 = inlined_call_operand.vmem [shape: f32[128,96], index: 0, kind: input, shape index: {}]   ;;  %s4744_s1 = inlined_call_operand.vmem [shape: f32[32,96], index: 1, kind: input, shape index: {}]   ;;  %s4745_s5 = inlined_call_operand.vmem [shape: f32[8,32], index: 5, kind: input, shape index: {}]   ;;  %s4746_s2 = inlined_call_operand.vmem [shape: f32[1,96], index: 2, kind: input, shape index: {}]   ;;  %s4747_s3 = inlined_call_operand.vmem [shape: f32[32,128], index: 3, kind: input, shape index: {}]   ;;  %s4748_s4 = inlined_call_operand.vmem [shape: f32[1,128], index: 4, kind: input, shape index: {}]   ;;  %s4749_s7 = inlined_call_operand.vmem [shape: f32[8,32], index: 7, kind: output, shape index: {1}]   ;;  %s4750_s6 = inlined_call_operand.vmem [shape: f32[8,8,128], index: 6, kind: output, shape index: {0}]  }
   0x1   :  { %3509 = vmatprep.subr.bf16.mxu0 %v3887_v0  ;;  %3533 = vmatprep.subr.bf16.mxu1 %v3887_v0  ;;  %v26_v1 = vld [vmem:[%s4743_s0] sm:$0xff]  ;;  %v27_v2 = vld [vmem:[%s4743_s0 + $0x8] sm:$0xff]  ;;  %v28_v6 = vld [vmem:[%s4743_s0 + $0x10] sm:$0xff]  ;;  %v52_v30 = vlaneseq  ;;  %v3890_v35 = vmov 1.0   ;;  %s3893_s27 = smov 32  }
   0x2   :  { %v42_v3 = vld [vmem:[%s4744_s1] sm:$0xff]  ;;  %v3946_v4 = vpack.c.bf16 %v27_v2, %v26_v1  ;;  %v43_v5 = vld [vmem:[%s4744_s1 + $0x8] sm:$0xff]  ;;  %v29_v7 = vld [vmem:[%s4743_s0 + $0x18] sm:$0xff]  ;;  %3096 = vmatprep.mubr.msk.f32.mxu1 %vm3888_vm0, %v3889_v8  ;;  %3085 = vmatprep.mubr.msk.f32.mxu0 %vm3888_vm0, %v3889_v8 }
   0x3   :  { %v3961_v9 = vpack.c.bf16 %v43_v5, %v42_v3  ;;  %v44_v10 = vld [vmem:[%s4744_s1 + $0x10] sm:$0xff]  ;;  %v45_v11 = vld [vmem:[%s4744_s1 + $0x18] sm:$0xff]  ;;  %v3970_v12 = vpack.c.bf16 %v29_v7, %v28_v6  ;;  %v30_v14 = vld [vmem:[%s4743_s0 + $0x20] sm:$0xff]  ;;  %v4048_v34 = vand.u32 127, %v52_v30 }
   0x4   :  { %3511 = vmatpush3.bf16.msra.mxu0 %v3946_v4  ;;  %v3974_v13 = vpack.c.bf16 %v45_v11, %v44_v10  ;;  %v31_v15 = vld [vmem:[%s4743_s0 + $0x28] sm:$0xff]  ;;  %v3991_v17 = vld [vmem:[%s4745_s5] sm:$0xff]  ;;  %v32_v18 = vld [vmem:[%s4743_s0 + $0x30] sm:$0xff] }
   0x5   :  { %3535 = vmatpush3.bf16.msra.mxu1 %v3961_v9  ;;  %3512 = vmatprep.subr.bf16.mxu0 %v3887_v0  ;;  %v3984_v16 = vpack.c.bf16 %v31_v15, %v30_v14  ;;  %v33_v19 = vld [vmem:[%s4743_s0 + $0x38] sm:$0xff]  ;;  %v34_v21 = vld [vmem:[%s4743_s0 + $0x40] sm:$0xff]  ;;  %v35_v22 = vld [vmem:[%s4743_s0 + $0x48] sm:$0xff]  ;;  %vm54_vm2 = vcmp.eq.s32.totalorder %v4048_v34, 0 }
   0x6   :  { %3536 = vmatprep.subr.bf16.mxu1 %v3887_v0  ;;  %v4003_v20 = vpack.c.bf16 %v33_v19, %v32_v18  ;;  %v4015_v23 = vpack.c.bf16 %v35_v22, %v34_v21  ;;  %v36_v24 = vld [vmem:[%s4743_s0 + $0x50] sm:$0xff]  ;;  %v37_v25 = vld [vmem:[%s4743_s0 + $0x58] sm:$0xff]  ;;  %v38_v27 = vld [vmem:[%s4743_s0 + $0x60] sm:$0xff] }
   0x7   :  { %v4025_v26 = vpack.c.bf16 %v37_v25, %v36_v24  ;;  %v39_v28 = vld [vmem:[%s4743_s0 + $0x68] sm:$0xff]  ;;  %v40_v31 = vld [vmem:[%s4743_s0 + $0x70] sm:$0xff]  ;;  %v41_v32 = vld [vmem:[%s4743_s0 + $0x78] sm:$0xff] }
   0x8   :  { %3514 = vmatpush3.bf16.msra.mxu0 %v3970_v12  ;;  %v4035_v29 = vpack.c.bf16 %v39_v28, %v38_v27  ;;  %v4045_v33 = vpack.c.bf16 %v41_v32, %v40_v31  ;;  %v4064_v36 = vld [vmem:[%s4746_s2] ss:$0 sm:$0xff]  ;;  %v48_v52 = vld [vmem:[%s4747_s3 + $0x8] sm:$0xff]  ;;  %v49_v53 = vld [vmem:[%s4747_s3 + $0x10] sm:$0xff] }
   0x9   :  { %3538 = vmatpush3.bf16.msra.mxu1 %v3974_v13  ;;  %3515 = vmatprep.subr.bf16.mxu0 %v3887_v0  ;;  %v47_v51 = vld [vmem:[%s4747_s3] sm:$0xff]  ;;  %v50_v55 = vld [vmem:[%s4747_s3 + $0x18] sm:$0xff] }
   0xa   :  { %3539 = vmatprep.subr.bf16.mxu1 %v3887_v0  ;;  %v4078_v54 = vpack.c.bf16 %v48_v52, %v47_v51  ;;  %v4084_v57 = vpack.c.bf16 %v50_v55, %v49_v53  ;;  %v4124_v2 = vld [vmem:[%s4748_s4] ss:$0 sm:$0xff] }
   0xc   :  { %3097 = vmatmul.mubr.msk.f32.vlgmr.msra.gmra.mrb[0].mxu1 %vm133_vm1, %v3991_v17  ;;  %3517 = vmatpush3.bf16.msra.mxu0 %v3984_v16 }
   0xd   :  { %3518 = vmatprep.subr.bf16.mxu0 %v3887_v0  ;;  %3107 = vmatprep.mubr.msk.f32.mxu1 %vm3888_vm0, %v3889_v8 }
   0xe   :  { %3541 = vmatpush3.bf16.msra.mxu1 %v4078_v54 }
   0xf   :  { %3542 = vmatprep.subr.bf16.mxu1 %v3887_v0 }
  0x10   :  { %3520 = vmatpush3.bf16.msra.mxu0 %v4003_v20 }
  0x11   :  { %3521 = vmatprep.subr.bf16.mxu0 %v3887_v0 }
  0x12   :  { %3544 = vmatpush3.bf16.msra.mxu1 %v4084_v57 }
  0x13   :  { %3545 = vmatprep.subr.bf16.mxu1 %v3887_v0 }
  0x14   :  { %3523 = vmatpush3.bf16.msra.mxu0 %v4015_v23 }
  0x15   :  { %3524 = vmatprep.subr.bf16.mxu0 %v3887_v0 }
  0x18   :  { %3526 = vmatpush3.bf16.msra.mxu0 %v4025_v26 }
  0x19   :  { %3527 = vmatprep.subr.bf16.mxu0 %v3887_v0 }
  0x1c   :  { %3529 = vmatpush3.bf16.msra.mxu0 %v4035_v29 }
  0x1d   :  { %3530 = vmatprep.subr.bf16.mxu0 %v3887_v0 }
  0x20   :  { %3532 = vmatpush3.bf16.msra.mxu0 %v4045_v33 }
  0x21   :  { %3569 = vmatprep.subr.bf16.mxu0 %v3887_v0 }
  0x23   :  { %3086 = vmatmul.mubr.msk.f32.vlgmr.msra.gmra.mrb[0].mxu0 %vm54_vm2, %v3890_v35 }
  0x24   :  { %3571 = vmatpush3.bf16.msra.mxu0 %v3961_v9  ;;  %3153 = vmatprep.mubr.msk.f32.mxu0 %vm3888_vm0, %v3889_v8 }
  0x25   :  { %3572 = vmatprep.subr.bf16.mxu0 %v3887_v0 }
  0x28   :  { %3574 = vmatpush3.bf16.msra.mxu0 %v3974_v13 }
  0x29   :  { %3575 = vmatprep.subr.bf16.mxu0 %v3887_v0 }
  0xdf   :  { %v203_v37 = vpop.f32.mrb[0].mxu1 }
  0xe0   :  { %v204_v38 = vadd.f32 %v4064_v36, %v203_v37  ;;  %v3098_v39 = vpop.f32.mrb[1].mxu1 }
  0xe2   :  { %215 = vrot.lane.b32.xlu0 %v204_v38, %s3891_s19 }
  0xf6   :  { %v123_v40 = vpop.f32.mrb[0].mxu0 }
  0xf7   :  { %v207_v41 = vadd.f32 %v204_v38, %v123_v40  ;;  %v3087_v42 = vpop.f32.mrb[1].mxu0 }
  0xf9   :  { %v2767_v43 = vmul.f32 -1.442695, %v207_v41 }
  0xfb   :  { %3805 = vpow2.f32 %v2767_v43 }
 0x105   :  { %v3806_v44 = vpop.eup %3805 }
 0x106   :  { %v211_v45 = vadd.f32 1.0, %v3806_v44 }
 0x108   :  { %3807 = vrcp.f32 %v211_v45 }
 0x112   :  { %v3808_v46 = vpop.eup %3807 }
 0x113   :  { %v225_v59 = vsub.f32 1.0, %v3808_v46 }
 0x154   :  { %v216_v47 = vpop.permute.xlu0 %215 }
 0x155   :  { %v218_v48 = vmul.f32 %v3808_v46, %v216_v47 }
 0x157   :  { %220 = vrot.lane.b32.xlu0 %v218_v48, %s3891_s19 }
 0x1c9   :  { %v221_v49 = vpop.permute.xlu0 %220 }
 0x1ca   :  { %v223_v50 = vadd.f32 %v221_v49, %v123_v40 }
 0x1cc   :  { %3809 = vtanh.f32 %v223_v50 }
 0x1d6   :  { %v3810_v56 = vpop.eup %3809 }
 0x1d7   :  { %227 = vrot.lane.b32.xlu1 %v3810_v56, %s3892_s26 }
 0x1db   :  { %231 = vrot.lane.b32.xlu1 %v3991_v17, %s3893_s27 }
 0x249   :  { %v228_v58 = vpop.permute.xlu1 %227 }
 0x24a   :  { %v230_v61 = vmul.f32 %v228_v58, %v225_v59 }
 0x24d   :  { %v232_v60 = vpop.permute.xlu1 %231 }
 0x24e   :  { %v234_v62 = vmul.f32 %v3808_v46, %v232_v60 }
 0x250   :  { %v4091_v63 = vadd.f32 %v234_v62, %v230_v61 }
 0x252   :  { %243 = vrot.lane.b32.xlu0 %v4091_v63, %s3892_s26 }
 0x2c4   :  { %v244_v1 = vpop.permute.xlu0 %243 }
 0x2c5   :  { %3108 = vmatmul.mubr.msk.f32.vlgmr.msra.gmra.mrb[2].mxu1 %vm133_vm1, %v244_v1  ;;  %3154 = vmatmul.mubr.msk.f32.vlgmr.msra.gmra.mrb[2].mxu0 %vm133_vm1, %v244_v1 }
 0x2c6   :  { %3547 = vmatpush3.bf16.msra.mxu1 %v3946_v4  ;;  %3142 = vmatprep.mubr.msk.f32.mxu1 %vm3888_vm0, %v3889_v8 }
 0x2c7   :  { %3548 = vmatprep.subr.bf16.mxu1 %v3887_v0  ;;  %3577 = vmatpush3.bf16.msra.mxu0 %v4078_v54 }
 0x2c8   :  { %3578 = vmatprep.subr.bf16.mxu0 %v3887_v0  ;;  %3164 = vmatprep.mubr.msk.f32.mxu0 %vm3888_vm0, %v3889_v8 }
 0x2ca   :  { %3550 = vmatpush3.bf16.msra.mxu1 %v3970_v12 }
 0x2cb   :  { %3551 = vmatprep.subr.bf16.mxu1 %v3887_v0  ;;  %3580 = vmatpush3.bf16.msra.mxu0 %v4084_v57 }
 0x2cc   :  { %3581 = vmatprep.subr.bf16.mxu0 %v3887_v0 }
 0x2ce   :  { %3553 = vmatpush3.bf16.msra.mxu1 %v3984_v16 }
 0x2cf   :  { %3554 = vmatprep.subr.bf16.mxu1 %v3887_v0 }
 0x2d2   :  { %3556 = vmatpush3.bf16.msra.mxu1 %v4003_v20 }
 0x2d3   :  { %3557 = vmatprep.subr.bf16.mxu1 %v3887_v0 }
 0x2d6   :  { %3559 = vmatpush3.bf16.msra.mxu1 %v4015_v23 }
 0x2d7   :  { %3560 = vmatprep.subr.bf16.mxu1 %v3887_v0 }
 0x2da   :  { %3562 = vmatpush3.bf16.msra.mxu1 %v4025_v26 }
 0x2db   :  { %3563 = vmatprep.subr.bf16.mxu1 %v3887_v0 }
 0x2de   :  { %3565 = vmatpush3.bf16.msra.mxu1 %v4035_v29 }
 0x2df   :  { %3566 = vmatprep.subr.bf16.mxu1 %v3887_v0 }
 0x2e2   :  { %3568 = vmatpush3.bf16.msra.mxu1 %v4045_v33 }
 0x2e3   :  { %3605 = vmatprep.subr.bf16.mxu1 %v3887_v0 }
 0x398   :  { %v313_v3 = vpop.f32.mrb[2].mxu1  ;;  %v549_v5 = vpop.f32.mrb[2].mxu0 }
 0x399   :  { %v4127_v6 = vadd.f32 %v4124_v2, %v313_v3  ;;  %v3109_v7 = vpop.f32.mrb[3].mxu1  ;;  %v3155_v10 = vpop.f32.mrb[3].mxu0  ;;  %v550_v11 = vadd.f32 %v4064_v36, %v549_v5 }
 0x39b   :  { %317 = vmax.xlane.f32.xlu1 %v4127_v6 }
 0x3ac   :  { %561 = vrot.lane.b32.xlu1 %v550_v11, %s3891_s19 }
 0x428   :  { %v4132_v14 = vpop.xlane.xlu1 %317 }
 0x429   :  { %vm394_vm3 = vcmp.ge.f32.partialorder %v4127_v6, %v4132_v14 }
 0x42a   :  { %v395_v15 = vsel %vm394_vm3, %v4048_v34, 128 }
 0x42b   :  { %v397_v17 = vshra.s32 %v395_v15, 16  ;;  %v396_v19 = vand.u32 65535, %v395_v15 }
 0x42c   :  { %v562_v44 = vpop.permute.xlu1 %561 }
 0x42d   :  { %v399_v18 = vcvt.s32.f32 %v397_v17  ;;  %v398_v22 = vcvt.s32.f32 %v396_v19 }
 0x42f   :  { %400 = vmin.xlane.f32.xlu0 %v399_v18 }
 0x4bc   :  { %v401_v21 = vpop.xlane.xlu0 %400 }
 0x4bd   :  { %vm402_vm4 = vcmp.eq.f32.partialorder %v399_v18, %v401_v21  ;;  %v407_v25 = vcvt.f32.s32 %v401_v21 }
 0x4be   :  { %v403_v24 = vsel %vm402_vm4, %v398_v22, inf }
 0x4bf   :  { %404 = vmin.xlane.f32.xlu0 %v403_v24  ;;  %v408_v28 = vshll.u32 %v407_v25, 16 }
 0x54c   :  { %v405_v27 = vpop.xlane.xlu0 %404 }
 0x54d   :  { %v406_v31 = vcvt.f32.s32 %v405_v27 }
 0x54f   :  { %v409_v32 = vadd.s32 %v408_v28, %v406_v31 }
 0x551   :  { %vm410_vm5 = vcmp.eq.s32.totalorder %v4048_v34, %v409_v32 }
 0x552   :  { %3143 = vmatmul.mubr.msk.f32.vlgmr.msra.gmra.mrb[4].mxu1 %vm410_vm5, %v3890_v35 }
 0x553   :  { %3607 = vmatpush3.bf16.msra.mxu1 %v3961_v9  ;;  %3210 = vmatprep.mubr.msk.f32.mxu1 %vm3888_vm0, %v3889_v8 }
 0x554   :  { %3608 = vmatprep.subr.bf16.mxu1 %v3887_v0 }
 0x557   :  { %3610 = vmatpush3.bf16.msra.mxu1 %v3974_v13 }
 0x558   :  { %3611 = vmatprep.subr.bf16.mxu1 %v3887_v0 }
 0x625   :  { %v479_v37 = vpop.f32.mrb[4].mxu1 }
 0x626   :  { %v553_v38 = vadd.f32 %v550_v11, %v479_v37  ;;  %v3144_v39 = vpop.f32.mrb[5].mxu1 }
 0x628   :  { %v2777_v40 = vmul.f32 -1.442695, %v553_v38 }
 0x62a   :  { %3811 = vpow2.f32 %v2777_v40 }
 0x634   :  { %v3812_v41 = vpop.eup %3811 }
 0x635   :  { %v557_v42 = vadd.f32 1.0, %v3812_v41 }
 0x637   :  { %3813 = vrcp.f32 %v557_v42 }
 0x641   :  { %v3814_v43 = vpop.eup %3813 }
 0x642   :  { %v564_v45 = vmul.f32 %v3814_v43, %v562_v44  ;;  %v571_v49 = vsub.f32 1.0, %v3814_v43  ;;  %v577_v51 = vmul.f32 %v3814_v43, %v4091_v63 }
 0x644   :  { %566 = vrot.lane.b32.xlu0 %v564_v45, %s3891_s19 }
 0x6b6   :  { %v567_v46 = vpop.permute.xlu0 %566 }
 0x6b7   :  { %v569_v47 = vadd.f32 %v567_v46, %v479_v37 }
 0x6b9   :  { %3815 = vtanh.f32 %v569_v47 }
 0x6c3   :  { %v3816_v48 = vpop.eup %3815 }
 0x6c4   :  { %573 = vrot.lane.b32.xlu1 %v3816_v48, %s3892_s26 }
 0x736   :  { %v574_v50 = vpop.permute.xlu1 %573 }
 0x737   :  { %v576_v52 = vmul.f32 %v574_v50, %v571_v49 }
 0x739   :  { %v4148_v53 = vadd.f32 %v577_v51, %v576_v52 }
 0x73b   :  { %580 = vrot.lane.b32.xlu1 %v4148_v53, %s3892_s26 }
 0x7ad   :  { %v581_v55 = vpop.permute.xlu1 %580 }
 0x7ae   :  { %3165 = vmatmul.mubr.msk.f32.vlgmr.msra.gmra.mrb[4].mxu0 %vm133_vm1, %v581_v55  ;;  %3211 = vmatmul.mubr.msk.f32.vlgmr.msra.gmra.mrb[6].mxu1 %vm133_vm1, %v581_v55 }
 0x7af   :  { %3583 = vmatpush3.bf16.msra.mxu0 %v3946_v4  ;;  %3199 = vmatprep.mubr.msk.f32.mxu0 %vm3888_vm0, %v3889_v8 }
 0x7b0   :  { %3584 = vmatprep.subr.bf16.mxu0 %v3887_v0  ;;  %3613 = vmatpush3.bf16.msra.mxu1 %v4078_v54 }
 0x7b1   :  { %3614 = vmatprep.subr.bf16.mxu1 %v3887_v0  ;;  %3221 = vmatprep.mubr.msk.f32.mxu1 %vm3888_vm0, %v3889_v8 }
 0x7b3   :  { %3586 = vmatpush3.bf16.msra.mxu0 %v3970_v12 }
 0x7b4   :  { %3587 = vmatprep.subr.bf16.mxu0 %v3887_v0  ;;  %3616 = vmatpush3.bf16.msra.mxu1 %v4084_v57 }
 0x7b5   :  { %3617 = vmatprep.subr.bf16.mxu1 %v3887_v0 }
 0x7b7   :  { %3589 = vmatpush3.bf16.msra.mxu0 %v3984_v16 }
 0x7b8   :  { %3590 = vmatprep.subr.bf16.mxu0 %v3887_v0 }
 0x7bb   :  { %3592 = vmatpush3.bf16.msra.mxu0 %v4003_v20 }
 0x7bc   :  { %3593 = vmatprep.subr.bf16.mxu0 %v3887_v0 }
 0x7bf   :  { %3595 = vmatpush3.bf16.msra.mxu0 %v4015_v23 }
 0x7c0   :  { %3596 = vmatprep.subr.bf16.mxu0 %v3887_v0 }
 0x7c3   :  { %3598 = vmatpush3.bf16.msra.mxu0 %v4025_v26 }
 0x7c4   :  { %3599 = vmatprep.subr.bf16.mxu0 %v3887_v0 }
 0x7c7   :  { %3601 = vmatpush3.bf16.msra.mxu0 %v4035_v29 }
 0x7c8   :  { %3602 = vmatprep.subr.bf16.mxu0 %v3887_v0 }
 0x7cb   :  { %3604 = vmatpush3.bf16.msra.mxu0 %v4045_v33 }
 0x7cc   :  { %3641 = vmatprep.subr.bf16.mxu0 %v3887_v0 }
 0x881   :  { %v650_v56 = vpop.f32.mrb[4].mxu0  ;;  %v886_v58 = vpop.f32.mrb[6].mxu1 }
 0x882   :  { %v4179_v59 = vadd.f32 %v4124_v2, %v650_v56  ;;  %v3166_v60 = vpop.f32.mrb[5].mxu0  ;;  %v3212_v61 = vpop.f32.mrb[7].mxu1  ;;  %v887_v15 = vadd.f32 %v4064_v36, %v886_v58 }
 0x884   :  { %654 = vmax.xlane.f32.xlu0 %v4179_v59 }
 0x911   :  { %v4182_v62 = vpop.xlane.xlu0 %654 }
 0x912   :  { %vm731_vm6 = vcmp.ge.f32.partialorder %v4179_v59, %v4182_v62 }
 0x913   :  { %v732_v63 = vsel %vm731_vm6, %v4048_v34, 128 }
 0x914   :  { %v734_v1 = vshra.s32 %v732_v63, 16  ;;  %v733_v5 = vand.u32 65535, %v732_v63 }
 0x916   :  { %v736_v3 = vcvt.s32.f32 %v734_v1  ;;  %v735_v10 = vcvt.s32.f32 %v733_v5 }
 0x918   :  { %737 = vmin.xlane.f32.xlu1 %v736_v3 }
 0x9a5   :  { %v738_v7 = vpop.xlane.xlu1 %737 }
 0x9a6   :  { %vm739_vm7 = vcmp.eq.f32.partialorder %v736_v3, %v738_v7  ;;  %v744_v17 = vcvt.f32.s32 %v738_v7 }
 0x9a7   :  { %v740_v11 = vsel %vm739_vm7, %v735_v10, inf }
 0x9a8   :  { %741 = vmin.xlane.f32.xlu0 %v740_v11  ;;  %v745_v19 = vshll.u32 %v744_v17, 16 }
 0x9be   :  { %898 = vrot.lane.b32.xlu0 %v887_v15, %s3891_s19 }
 0xa35   :  { %v742_v18 = vpop.xlane.xlu0 %741 }
 0xa36   :  { %v743_v21 = vcvt.f32.s32 %v742_v18 }
 0xa38   :  { %v746_v22 = vadd.s32 %v745_v19, %v743_v21 }
 0xa39   :  { %v899_v38 = vpop.permute.xlu0 %898 }
 0xa3a   :  { %vm747_vm8 = vcmp.eq.s32.totalorder %v4048_v34, %v746_v22 }
 0xa3b   :  { %3200 = vmatmul.mubr.msk.f32.vlgmr.msra.gmra.mrb[6].mxu0 %vm747_vm8, %v3890_v35 }
 0xa3c   :  { %3643 = vmatpush3.bf16.msra.mxu0 %v3961_v9  ;;  %3267 = vmatprep.mubr.msk.f32.mxu0 %vm3888_vm0, %v3889_v8 }
 0xa3d   :  { %3644 = vmatprep.subr.bf16.mxu0 %v3887_v0 }
 0xa40   :  { %3646 = vmatpush3.bf16.msra.mxu0 %v3974_v13 }
 0xa41   :  { %3647 = vmatprep.subr.bf16.mxu0 %v3887_v0 }
 0xb0e   :  { %v816_v24 = vpop.f32.mrb[6].mxu0 }
 0xb0f   :  { %v890_v25 = vadd.f32 %v887_v15, %v816_v24  ;;  %v3201_v27 = vpop.f32.mrb[7].mxu0 }
 0xb11   :  { %v2786_v28 = vmul.f32 -1.442695, %v890_v25 }
 0xb13   :  { %3817 = vpow2.f32 %v2786_v28 }
 0xb1d   :  { %v3818_v31 = vpop.eup %3817 }
 0xb1e   :  { %v894_v32 = vadd.f32 1.0, %v3818_v31 }
 0xb20   :  { %3819 = vrcp.f32 %v894_v32 }
 0xb2a   :  { %v3820_v37 = vpop.eup %3819 }
 0xb2b   :  { %v901_v39 = vmul.f32 %v3820_v37, %v899_v38  ;;  %v908_v43 = vsub.f32 1.0, %v3820_v37  ;;  %v914_v45 = vmul.f32 %v3820_v37, %v4148_v53 }
 0xb2d   :  { %903 = vrot.lane.b32.xlu1 %v901_v39, %s3891_s19 }
 0xb9f   :  { %v904_v40 = vpop.permute.xlu1 %903 }
 0xba0   :  { %v906_v41 = vadd.f32 %v904_v40, %v816_v24 }
 0xba2   :  { %3821 = vtanh.f32 %v906_v41 }
 0xbac   :  { %v3822_v42 = vpop.eup %3821 }
 0xbad   :  { %910 = vrot.lane.b32.xlu1 %v3822_v42, %s3892_s26 }
 0xc1f   :  { %v911_v44 = vpop.permute.xlu1 %910 }
 0xc20   :  { %v913_v46 = vmul.f32 %v911_v44, %v908_v43 }
 0xc22   :  { %v4200_v47 = vadd.f32 %v914_v45, %v913_v46 }
 0xc24   :  { %917 = vrot.lane.b32.xlu0 %v4200_v47, %s3892_s26 }
 0xc96   :  { %v918_v48 = vpop.permute.xlu0 %917 }
 0xc97   :  { %3222 = vmatmul.mubr.msk.f32.vlgmr.msra.gmra.mrb[8].mxu1 %vm133_vm1, %v918_v48  ;;  %3268 = vmatmul.mubr.msk.f32.vlgmr.msra.gmra.mrb[8].mxu0 %vm133_vm1, %v918_v48 }
 0xc98   :  { %3619 = vmatpush3.bf16.msra.mxu1 %v3946_v4  ;;  %3256 = vmatprep.mubr.msk.f32.mxu1 %vm3888_vm0, %v3889_v8 }
 0xc99   :  { %3620 = vmatprep.subr.bf16.mxu1 %v3887_v0  ;;  %3649 = vmatpush3.bf16.msra.mxu0 %v4078_v54 }
 0xc9a   :  { %3650 = vmatprep.subr.bf16.mxu0 %v3887_v0  ;;  %3278 = vmatprep.mubr.msk.f32.mxu0 %vm3888_vm0, %v3889_v8 }
 0xc9c   :  { %3622 = vmatpush3.bf16.msra.mxu1 %v3970_v12 }
 0xc9d   :  { %3623 = vmatprep.subr.bf16.mxu1 %v3887_v0  ;;  %3652 = vmatpush3.bf16.msra.mxu0 %v4084_v57 }
 0xc9e   :  { %3653 = vmatprep.subr.bf16.mxu0 %v3887_v0 }
 0xca0   :  { %3625 = vmatpush3.bf16.msra.mxu1 %v3984_v16 }
 0xca1   :  { %3626 = vmatprep.subr.bf16.mxu1 %v3887_v0 }
 0xca4   :  { %3628 = vmatpush3.bf16.msra.mxu1 %v4003_v20 }
 0xca5   :  { %3629 = vmatprep.subr.bf16.mxu1 %v3887_v0 }
 0xca8   :  { %3631 = vmatpush3.bf16.msra.mxu1 %v4015_v23 }
 0xca9   :  { %3632 = vmatprep.subr.bf16.mxu1 %v3887_v0 }
 0xcac   :  { %3634 = vmatpush3.bf16.msra.mxu1 %v4025_v26 }
 0xcad   :  { %3635 = vmatprep.subr.bf16.mxu1 %v3887_v0 }
 0xcb0   :  { %3637 = vmatpush3.bf16.msra.mxu1 %v4035_v29 }
 0xcb1   :  { %3638 = vmatprep.subr.bf16.mxu1 %v3887_v0 }
 0xcb4   :  { %3640 = vmatpush3.bf16.msra.mxu1 %v4045_v33 }
 0xcb5   :  { %3677 = vmatprep.subr.bf16.mxu1 %v3887_v0 }
 0xd6a   :  { %v987_v49 = vpop.f32.mrb[8].mxu1  ;;  %v1223_v50 = vpop.f32.mrb[8].mxu0 }
 0xd6b   :  { %v4231_v51 = vadd.f32 %v4124_v2, %v987_v49  ;;  %v3223_v52 = vpop.f32.mrb[9].mxu1  ;;  %v3269_v53 = vpop.f32.mrb[9].mxu0  ;;  %v1224_v55 = vadd.f32 %v4064_v36, %v1223_v50 }
 0xd6d   :  { %991 = vmax.xlane.f32.xlu1 %v4231_v51 }
 0xd7e   :  { %1235 = vrot.lane.b32.xlu1 %v1224_v55, %s3891_s19 }
 0xdfa   :  { %v4236_v56 = vpop.xlane.xlu1 %991 }
 0xdfb   :  { %vm1068_vm9 = vcmp.ge.f32.partialorder %v4231_v51, %v4236_v56 }
 0xdfc   :  { %v1069_v58 = vsel %vm1068_vm9, %v4048_v34, 128 }
 0xdfd   :  { %v1071_v60 = vshra.s32 %v1069_v58, 16  ;;  %v1070_v63 = vand.u32 65535, %v1069_v58 }
 0xdfe   :  { %v1236_v28 = vpop.permute.xlu1 %1235 }
 0xdff   :  { %v1073_v61 = vcvt.s32.f32 %v1071_v60  ;;  %v1072_v3 = vcvt.s32.f32 %v1070_v63 }
 0xe01   :  { %1074 = vmin.xlane.f32.xlu0 %v1073_v61 }
 0xe8e   :  { %v1075_v1 = vpop.xlane.xlu0 %1074 }
 0xe8f   :  { %vm1076_vm10 = vcmp.eq.f32.partialorder %v1073_v61, %v1075_v1  ;;  %v1081_v7 = vcvt.f32.s32 %v1075_v1 }
 0xe90   :  { %v1077_v5 = vsel %vm1076_vm10, %v1072_v3, inf }
 0xe91   :  { %1078 = vmin.xlane.f32.xlu0 %v1077_v5  ;;  %v1082_v11 = vshll.u32 %v1081_v7, 16 }
 0xf1e   :  { %v1079_v10 = vpop.xlane.xlu0 %1078 }
 0xf1f   :  { %v1080_v15 = vcvt.f32.s32 %v1079_v10 }
 0xf21   :  { %v1083_v17 = vadd.s32 %v1082_v11, %v1080_v15 }
 0xf23   :  { %vm1084_vm11 = vcmp.eq.s32.totalorder %v4048_v34, %v1083_v17 }
 0xf24   :  { %3257 = vmatmul.mubr.msk.f32.vlgmr.msra.gmra.mrb[10].mxu1 %vm1084_vm11, %v3890_v35 }
 0xf25   :  { %3679 = vmatpush3.bf16.msra.mxu1 %v3961_v9  ;;  %3324 = vmatprep.mubr.msk.f32.mxu1 %vm3888_vm0, %v3889_v8 }
 0xf26   :  { %3680 = vmatprep.subr.bf16.mxu1 %v3887_v0 }
 0xf29   :  { %3682 = vmatpush3.bf16.msra.mxu1 %v3974_v13 }
 0xf2a   :  { %3683 = vmatprep.subr.bf16.mxu1 %v3887_v0 }
 0xff7   :  { %v1153_v18 = vpop.f32.mrb[10].mxu1 }
 0xff8   :  { %v1227_v19 = vadd.f32 %v1224_v55, %v1153_v18  ;;  %v3258_v21 = vpop.f32.mrb[11].mxu1 }
 0xffa   :  { %v2795_v22 = vmul.f32 -1.442695, %v1227_v19 }
 0xffc   :  { %3823 = vpow2.f32 %v2795_v22 }
0x1006   :  { %v3824_v24 = vpop.eup %3823 }
0x1007   :  { %v1231_v25 = vadd.f32 1.0, %v3824_v24 }
0x1009   :  { %3825 = vrcp.f32 %v1231_v25 }
0x1013   :  { %v3826_v27 = vpop.eup %3825 }
0x1014   :  { %v1238_v31 = vmul.f32 %v3826_v27, %v1236_v28  ;;  %v1245_v39 = vsub.f32 1.0, %v3826_v27  ;;  %v1251_v41 = vmul.f32 %v3826_v27, %v4200_v47 }
0x1016   :  { %1240 = vrot.lane.b32.xlu0 %v1238_v31, %s3891_s19 }
0x1088   :  { %v1241_v32 = vpop.permute.xlu0 %1240 }
0x1089   :  { %v1243_v37 = vadd.f32 %v1241_v32, %v1153_v18 }
0x108b   :  { %3827 = vtanh.f32 %v1243_v37 }
0x1095   :  { %v3828_v38 = vpop.eup %3827 }
0x1096   :  { %1247 = vrot.lane.b32.xlu1 %v3828_v38, %s3892_s26 }
0x1108   :  { %v1248_v40 = vpop.permute.xlu1 %1247 }
0x1109   :  { %v1250_v42 = vmul.f32 %v1248_v40, %v1245_v39 }
0x110b   :  { %v4252_v43 = vadd.f32 %v1251_v41, %v1250_v42 }
0x110d   :  { %1254 = vrot.lane.b32.xlu1 %v4252_v43, %s3892_s26 }
0x117f   :  { %v1255_v44 = vpop.permute.xlu1 %1254 }
0x1180   :  { %3279 = vmatmul.mubr.msk.f32.vlgmr.msra.gmra.mrb[10].mxu0 %vm133_vm1, %v1255_v44  ;;  %3325 = vmatmul.mubr.msk.f32.vlgmr.msra.gmra.mrb[12].mxu1 %vm133_vm1, %v1255_v44 }
0x1181   :  { %3655 = vmatpush3.bf16.msra.mxu0 %v3946_v4  ;;  %3313 = vmatprep.mubr.msk.f32.mxu0 %vm3888_vm0, %v3889_v8 }
0x1182   :  { %3656 = vmatprep.subr.bf16.mxu0 %v3887_v0  ;;  %3685 = vmatpush3.bf16.msra.mxu1 %v4078_v54 }
0x1183   :  { %3686 = vmatprep.subr.bf16.mxu1 %v3887_v0  ;;  %3335 = vmatprep.mubr.msk.f32.mxu1 %vm3888_vm0, %v3889_v8 }
0x1185   :  { %3658 = vmatpush3.bf16.msra.mxu0 %v3970_v12 }
0x1186   :  { %3659 = vmatprep.subr.bf16.mxu0 %v3887_v0  ;;  %3688 = vmatpush3.bf16.msra.mxu1 %v4084_v57 }
0x1187   :  { %3689 = vmatprep.subr.bf16.mxu1 %v3887_v0 }
0x1189   :  { %3661 = vmatpush3.bf16.msra.mxu0 %v3984_v16 }
0x118a   :  { %3662 = vmatprep.subr.bf16.mxu0 %v3887_v0 }
0x118d   :  { %3664 = vmatpush3.bf16.msra.mxu0 %v4003_v20 }
0x118e   :  { %3665 = vmatprep.subr.bf16.mxu0 %v3887_v0 }
0x1191   :  { %3667 = vmatpush3.bf16.msra.mxu0 %v4015_v23 }
0x1192   :  { %3668 = vmatprep.subr.bf16.mxu0 %v3887_v0 }
0x1195   :  { %3670 = vmatpush3.bf16.msra.mxu0 %v4025_v26 }
0x1196   :  { %3671 = vmatprep.subr.bf16.mxu0 %v3887_v0 }
0x1199   :  { %3673 = vmatpush3.bf16.msra.mxu0 %v4035_v29 }
0x119a   :  { %3674 = vmatprep.subr.bf16.mxu0 %v3887_v0 }
0x119d   :  { %3676 = vmatpush3.bf16.msra.mxu0 %v4045_v33 }
0x119e   :  { %3713 = vmatprep.subr.bf16.mxu0 %v3887_v0 }
0x1253   :  { %v1324_v45 = vpop.f32.mrb[10].mxu0  ;;  %v1560_v46 = vpop.f32.mrb[12].mxu1 }
0x1254   :  { %v4283_v47 = vadd.f32 %v4124_v2, %v1324_v45  ;;  %v3280_v48 = vpop.f32.mrb[11].mxu0  ;;  %v3326_v49 = vpop.f32.mrb[13].mxu1  ;;  %v1561_v1 = vadd.f32 %v4064_v36, %v1560_v46 }
0x1256   :  { %1328 = vmax.xlane.f32.xlu0 %v4283_v47 }
0x12e3   :  { %v4286_v50 = vpop.xlane.xlu0 %1328 }
0x12e4   :  { %vm1405_vm12 = vcmp.ge.f32.partialorder %v4283_v47, %v4286_v50 }
0x12e5   :  { %v1406_v52 = vsel %vm1405_vm12, %v4048_v34, 128 }
0x12e6   :  { %v1408_v53 = vshra.s32 %v1406_v52, 16  ;;  %v1407_v58 = vand.u32 65535, %v1406_v52 }
0x12e8   :  { %v1410_v55 = vcvt.s32.f32 %v1408_v53  ;;  %v1409_v61 = vcvt.s32.f32 %v1407_v58 }
0x12ea   :  { %1411 = vmin.xlane.f32.xlu1 %v1410_v55 }
0x1377   :  { %v1412_v60 = vpop.xlane.xlu1 %1411 }
0x1378   :  { %vm1413_vm13 = vcmp.eq.f32.partialorder %v1410_v55, %v1412_v60  ;;  %v1418_v3 = vcvt.f32.s32 %v1412_v60 }
0x1379   :  { %v1414_v63 = vsel %vm1413_vm13, %v1409_v61, inf }
0x137a   :  { %1415 = vmin.xlane.f32.xlu0 %v1414_v63  ;;  %v1419_v7 = vshll.u32 %v1418_v3, 16 }
0x1390   :  { %1572 = vrot.lane.b32.xlu0 %v1561_v1, %s3891_s19 }
0x1407   :  { %v1416_v5 = vpop.xlane.xlu0 %1415 }
0x1408   :  { %v1417_v10 = vcvt.f32.s32 %v1416_v5 }
0x140a   :  { %v1420_v11 = vadd.s32 %v1419_v7, %v1417_v10 }
0x140b   :  { %v1573_v25 = vpop.permute.xlu0 %1572 }
0x140c   :  { %vm1421_vm14 = vcmp.eq.s32.totalorder %v4048_v34, %v1420_v11 }
0x140d   :  { %3314 = vmatmul.mubr.msk.f32.vlgmr.msra.gmra.mrb[12].mxu0 %vm1421_vm14, %v3890_v35 }
0x140e   :  { %3715 = vmatpush3.bf16.msra.mxu0 %v3961_v9  ;;  %3381 = vmatprep.mubr.msk.f32.mxu0 %vm3888_vm0, %v3889_v8 }
0x140f   :  { %3716 = vmatprep.subr.bf16.mxu0 %v3887_v0 }
0x1412   :  { %3718 = vmatpush3.bf16.msra.mxu0 %v3974_v13 }
0x1413   :  { %3719 = vmatprep.subr.bf16.mxu0 %v3887_v0 }
0x14e0   :  { %v1490_v15 = vpop.f32.mrb[12].mxu0 }
0x14e1   :  { %v1564_v17 = vadd.f32 %v1561_v1, %v1490_v15  ;;  %v3315_v18 = vpop.f32.mrb[13].mxu0 }
0x14e3   :  { %v2804_v19 = vmul.f32 -1.442695, %v1564_v17 }
0x14e5   :  { %3829 = vpow2.f32 %v2804_v19 }
0x14ef   :  { %v3830_v21 = vpop.eup %3829 }
0x14f0   :  { %v1568_v22 = vadd.f32 1.0, %v3830_v21 }
0x14f2   :  { %3831 = vrcp.f32 %v1568_v22 }
0x14fc   :  { %v3832_v24 = vpop.eup %3831 }
0x14fd   :  { %v1575_v27 = vmul.f32 %v3832_v24, %v1573_v25  ;;  %v1582_v37 = vsub.f32 1.0, %v3832_v24  ;;  %v1588_v39 = vmul.f32 %v3832_v24, %v4252_v43 }
0x14ff   :  { %1577 = vrot.lane.b32.xlu1 %v1575_v27, %s3891_s19 }
0x1571   :  { %v1578_v28 = vpop.permute.xlu1 %1577 }
0x1572   :  { %v1580_v31 = vadd.f32 %v1578_v28, %v1490_v15 }
0x1574   :  { %3833 = vtanh.f32 %v1580_v31 }
0x157e   :  { %v3834_v32 = vpop.eup %3833 }
0x157f   :  { %1584 = vrot.lane.b32.xlu1 %v3834_v32, %s3892_s26 }
0x15f1   :  { %v1585_v38 = vpop.permute.xlu1 %1584 }
0x15f2   :  { %v1587_v40 = vmul.f32 %v1585_v38, %v1582_v37 }
0x15f4   :  { %v4304_v41 = vadd.f32 %v1588_v39, %v1587_v40 }
0x15f6   :  { %1591 = vrot.lane.b32.xlu0 %v4304_v41, %s3892_s26 }
0x1668   :  { %v1592_v42 = vpop.permute.xlu0 %1591 }
0x1669   :  { %3336 = vmatmul.mubr.msk.f32.vlgmr.msra.gmra.mrb[14].mxu1 %vm133_vm1, %v1592_v42  ;;  %3382 = vmatmul.mubr.msk.f32.vlgmr.msra.gmra.mrb[14].mxu0 %vm133_vm1, %v1592_v42 }
0x166a   :  { %3691 = vmatpush3.bf16.msra.mxu1 %v3946_v4  ;;  %3370 = vmatprep.mubr.msk.f32.mxu1 %vm3888_vm0, %v3889_v8 }
0x166b   :  { %3692 = vmatprep.subr.bf16.mxu1 %v3887_v0  ;;  %3721 = vmatpush3.bf16.msra.mxu0 %v4078_v54 }
0x166c   :  { %3722 = vmatprep.subr.bf16.mxu0 %v3887_v0  ;;  %3392 = vmatprep.mubr.msk.f32.mxu0 %vm3888_vm0, %v3889_v8 }
0x166e   :  { %3694 = vmatpush3.bf16.msra.mxu1 %v3970_v12 }
0x166f   :  { %3695 = vmatprep.subr.bf16.mxu1 %v3887_v0  ;;  %3724 = vmatpush3.bf16.msra.mxu0 %v4084_v57 }
0x1670   :  { %3725 = vmatprep.subr.bf16.mxu0 %v3887_v0 }
0x1672   :  { %3697 = vmatpush3.bf16.msra.mxu1 %v3984_v16 }
0x1673   :  { %3698 = vmatprep.subr.bf16.mxu1 %v3887_v0 }
0x1676   :  { %3700 = vmatpush3.bf16.msra.mxu1 %v4003_v20 }
0x1677   :  { %3701 = vmatprep.subr.bf16.mxu1 %v3887_v0 }
0x167a   :  { %3703 = vmatpush3.bf16.msra.mxu1 %v4015_v23 }
0x167b   :  { %3704 = vmatprep.subr.bf16.mxu1 %v3887_v0 }
0x167e   :  { %3706 = vmatpush3.bf16.msra.mxu1 %v4025_v26 }
0x167f   :  { %3707 = vmatprep.subr.bf16.mxu1 %v3887_v0 }
0x1682   :  { %3709 = vmatpush3.bf16.msra.mxu1 %v4035_v29 }
0x1683   :  { %3710 = vmatprep.subr.bf16.mxu1 %v3887_v0 }
0x1686   :  { %3712 = vmatpush3.bf16.msra.mxu1 %v4045_v33 }
0x1687   :  { %3749 = vmatprep.subr.bf16.mxu1 %v3887_v0 }
0x173c   :  { %v1661_v43 = vpop.f32.mrb[14].mxu1  ;;  %v1897_v44 = vpop.f32.mrb[14].mxu0 }
0x173d   :  { %v4335_v45 = vadd.f32 %v4124_v2, %v1661_v43  ;;  %v3337_v46 = vpop.f32.mrb[15].mxu1  ;;  %v3383_v48 = vpop.f32.mrb[15].mxu0  ;;  %v1898_v49 = vadd.f32 %v4064_v36, %v1897_v44 }
0x173f   :  { %1665 = vmax.xlane.f32.xlu1 %v4335_v45 }
0x1750   :  { %1909 = vrot.lane.b32.xlu1 %v1898_v49, %s3891_s19 }
0x17cc   :  { %v4340_v52 = vpop.xlane.xlu1 %1665 }
0x17cd   :  { %vm1742_vm15 = vcmp.ge.f32.partialorder %v4335_v45, %v4340_v52 }
0x17ce   :  { %v1743_v53 = vsel %vm1742_vm15, %v4048_v34, 128 }
0x17cf   :  { %v1745_v55 = vshra.s32 %v1743_v53, 16  ;;  %v1744_v60 = vand.u32 65535, %v1743_v53 }
0x17d0   :  { %v1910_v25 = vpop.permute.xlu1 %1909 }
0x17d1   :  { %v1747_v58 = vcvt.s32.f32 %v1745_v55  ;;  %v1746_v63 = vcvt.s32.f32 %v1744_v60 }
0x17d3   :  { %1748 = vmin.xlane.f32.xlu0 %v1747_v58 }
0x1860   :  { %v1749_v61 = vpop.xlane.xlu0 %1748 }
0x1861   :  { %vm1750_vm2 = vcmp.eq.f32.partialorder %v1747_v58, %v1749_v61  ;;  %v1755_v3 = vcvt.f32.s32 %v1749_v61 }
0x1862   :  { %v1751_v1 = vsel %vm1750_vm2, %v1746_v63, inf }
0x1863   :  { %1752 = vmin.xlane.f32.xlu0 %v1751_v1  ;;  %v1756_v7 = vshll.u32 %v1755_v3, 16 }
0x18f0   :  { %v1753_v5 = vpop.xlane.xlu0 %1752 }
0x18f1   :  { %v1754_v10 = vcvt.f32.s32 %v1753_v5 }
0x18f3   :  { %v1757_v11 = vadd.s32 %v1756_v7, %v1754_v10 }
0x18f5   :  { %vm1758_vm3 = vcmp.eq.s32.totalorder %v4048_v34, %v1757_v11 }
0x18f6   :  { %3371 = vmatmul.mubr.msk.f32.vlgmr.msra.gmra.mrb[16].mxu1 %vm1758_vm3, %v3890_v35 }
0x18f7   :  { %3751 = vmatpush3.bf16.msra.mxu1 %v3961_v9  ;;  %3438 = vmatprep.mubr.msk.f32.mxu1 %vm3888_vm0, %v3889_v8 }
0x18f8   :  { %3752 = vmatprep.subr.bf16.mxu1 %v3887_v0 }
0x18fb   :  { %3754 = vmatpush3.bf16.msra.mxu1 %v3974_v13 }
0x18fc   :  { %3755 = vmatprep.subr.bf16.mxu1 %v3887_v0 }
0x19c9   :  { %v1827_v15 = vpop.f32.mrb[16].mxu1 }
0x19ca   :  { %v1901_v17 = vadd.f32 %v1898_v49, %v1827_v15  ;;  %v3372_v18 = vpop.f32.mrb[17].mxu1 }
0x19cc   :  { %v2813_v19 = vmul.f32 -1.442695, %v1901_v17 }
0x19ce   :  { %3835 = vpow2.f32 %v2813_v19 }
0x19d8   :  { %v3836_v21 = vpop.eup %3835 }
0x19d9   :  { %v1905_v22 = vadd.f32 1.0, %v3836_v21 }
0x19db   :  { %3837 = vrcp.f32 %v1905_v22 }
0x19e5   :  { %v3838_v24 = vpop.eup %3837 }
0x19e6   :  { %v1912_v27 = vmul.f32 %v3838_v24, %v1910_v25  ;;  %v1919_v37 = vsub.f32 1.0, %v3838_v24  ;;  %v1925_v39 = vmul.f32 %v3838_v24, %v4304_v41 }
0x19e8   :  { %1914 = vrot.lane.b32.xlu0 %v1912_v27, %s3891_s19 }
0x1a5a   :  { %v1915_v28 = vpop.permute.xlu0 %1914 }
0x1a5b   :  { %v1917_v31 = vadd.f32 %v1915_v28, %v1827_v15 }
0x1a5d   :  { %3839 = vtanh.f32 %v1917_v31 }
0x1a67   :  { %v3840_v32 = vpop.eup %3839 }
0x1a68   :  { %1921 = vrot.lane.b32.xlu1 %v3840_v32, %s3892_s26 }
0x1ada   :  { %v1922_v38 = vpop.permute.xlu1 %1921 }
0x1adb   :  { %v1924_v40 = vmul.f32 %v1922_v38, %v1919_v37 }
0x1add   :  { %v4356_v42 = vadd.f32 %v1925_v39, %v1924_v40 }
0x1adf   :  { %1928 = vrot.lane.b32.xlu1 %v4356_v42, %s3892_s26 }
0x1b51   :  { %v1929_v43 = vpop.permute.xlu1 %1928 }
0x1b52   :  { %3393 = vmatmul.mubr.msk.f32.vlgmr.msra.gmra.mrb[16].mxu0 %vm133_vm1, %v1929_v43  ;;  %3439 = vmatmul.mubr.msk.f32.vlgmr.msra.gmra.mrb[18].mxu1 %vm133_vm1, %v1929_v43 }
0x1b53   :  { %3727 = vmatpush3.bf16.msra.mxu0 %v3946_v4  ;;  %3427 = vmatprep.mubr.msk.f32.mxu0 %vm3888_vm0, %v3889_v8 }
0x1b54   :  { %3728 = vmatprep.subr.bf16.mxu0 %v3887_v0  ;;  %3757 = vmatpush3.bf16.msra.mxu1 %v4078_v54 }
0x1b55   :  { %3758 = vmatprep.subr.bf16.mxu1 %v3887_v0  ;;  %3449 = vmatprep.mubr.msk.f32.mxu1 %vm3888_vm0, %v3889_v8 }
0x1b57   :  { %3730 = vmatpush3.bf16.msra.mxu0 %v3970_v12 }
0x1b58   :  { %3731 = vmatprep.subr.bf16.mxu0 %v3887_v0  ;;  %3760 = vmatpush3.bf16.msra.mxu1 %v4084_v57 }
0x1b59   :  { %3761 = vmatprep.subr.bf16.mxu1 %v3887_v0 }
0x1b5b   :  { %3733 = vmatpush3.bf16.msra.mxu0 %v3984_v16 }
0x1b5c   :  { %3734 = vmatprep.subr.bf16.mxu0 %v3887_v0 }
0x1b5f   :  { %3736 = vmatpush3.bf16.msra.mxu0 %v4003_v20 }
0x1b60   :  { %3737 = vmatprep.subr.bf16.mxu0 %v3887_v0 }
0x1b63   :  { %3739 = vmatpush3.bf16.msra.mxu0 %v4015_v23 }
0x1b64   :  { %3740 = vmatprep.subr.bf16.mxu0 %v3887_v0 }
0x1b67   :  { %3742 = vmatpush3.bf16.msra.mxu0 %v4025_v26 }
0x1b68   :  { %3743 = vmatprep.subr.bf16.mxu0 %v3887_v0 }
0x1b6b   :  { %3745 = vmatpush3.bf16.msra.mxu0 %v4035_v29 }
0x1b6c   :  { %3746 = vmatprep.subr.bf16.mxu0 %v3887_v0 }
0x1b6f   :  { %3748 = vmatpush3.bf16.msra.mxu0 %v4045_v33 }
0x1b70   :  { %3785 = vmatprep.subr.bf16.mxu0 %v3887_v0 }
0x1c25   :  { %v1998_v41 = vpop.f32.mrb[16].mxu0  ;;  %v2234_v44 = vpop.f32.mrb[18].mxu1 }
0x1c26   :  { %v4387_v46 = vadd.f32 %v4124_v2, %v1998_v41  ;;  %v3394_v48 = vpop.f32.mrb[17].mxu0  ;;  %v3440_v49 = vpop.f32.mrb[19].mxu1  ;;  %v2235_v5 = vadd.f32 %v4064_v36, %v2234_v44 }
0x1c28   :  { %2002 = vmax.xlane.f32.xlu0 %v4387_v46 }
0x1cb5   :  { %v4390_v53 = vpop.xlane.xlu0 %2002 }
0x1cb6   :  { %vm2079_vm4 = vcmp.ge.f32.partialorder %v4387_v46, %v4390_v53 }
0x1cb7   :  { %v2080_v55 = vsel %vm2079_vm4, %v4048_v34, 128 }
0x1cb8   :  { %v2082_v58 = vshra.s32 %v2080_v55, 16  ;;  %v2081_v61 = vand.u32 65535, %v2080_v55 }
0x1cba   :  { %v2084_v60 = vcvt.s32.f32 %v2082_v58  ;;  %v2083_v1 = vcvt.s32.f32 %v2081_v61 }
0x1cbc   :  { %2085 = vmin.xlane.f32.xlu1 %v2084_v60 }
0x1d49   :  { %v2086_v63 = vpop.xlane.xlu1 %2085 }
0x1d4a   :  { %vm2087_vm5 = vcmp.eq.f32.partialorder %v2084_v60, %v2086_v63  ;;  %v2092_v7 = vcvt.f32.s32 %v2086_v63 }
0x1d4b   :  { %v2088_v3 = vsel %vm2087_vm5, %v2083_v1, inf }
0x1d4c   :  { %2089 = vmin.xlane.f32.xlu0 %v2088_v3  ;;  %v2093_v11 = vshll.u32 %v2092_v7, 16 }
0x1d62   :  { %2246 = vrot.lane.b32.xlu0 %v2235_v5, %s3891_s19 }
0x1dd9   :  { %v2090_v10 = vpop.xlane.xlu0 %2089 }
0x1dda   :  { %v2091_v15 = vcvt.f32.s32 %v2090_v10 }
0x1ddc   :  { %v2094_v17 = vadd.s32 %v2093_v11, %v2091_v15 }
0x1ddd   :  { %v2247_v27 = vpop.permute.xlu0 %2246 }
0x1dde   :  { %vm2095_vm6 = vcmp.eq.s32.totalorder %v4048_v34, %v2094_v17 }
0x1ddf   :  { %3428 = vmatmul.mubr.msk.f32.vlgmr.msra.gmra.mrb[18].mxu0 %vm2095_vm6, %v3890_v35 }
0x1de0   :  { %3787 = vmatpush3.bf16.msra.mxu0 %v3961_v9  ;;  %3495 = vmatprep.mubr.msk.f32.mxu0 %vm3888_vm0, %v3889_v8 }
0x1de1   :  { %3788 = vmatprep.subr.bf16.mxu0 %v3887_v0 }
0x1de4   :  { %3790 = vmatpush3.bf16.msra.mxu0 %v3974_v13 }
0x1de5   :  { %3791 = vmatprep.subr.bf16.mxu0 %v3887_v0 }
0x1eb2   :  { %v2164_v36 = vpop.f32.mrb[18].mxu0 }
0x1eb3   :  { %v2238_v18 = vadd.f32 %v2235_v5, %v2164_v36  ;;  %v3429_v19 = vpop.f32.mrb[19].mxu0 }
0x1eb5   :  { %v2822_v21 = vmul.f32 -1.442695, %v2238_v18 }
0x1eb7   :  { %3841 = vpow2.f32 %v2822_v21 }
0x1ec1   :  { %v3842_v22 = vpop.eup %3841 }
0x1ec2   :  { %v2242_v24 = vadd.f32 1.0, %v3842_v22  ;;  %v319_v22 = vsub.f32 %v4127_v6, %v4132_v14 }
0x1ec4   :  { %3843 = vrcp.f32 %v2242_v24  ;;  %v320_v24 = vmul.f32 1.442695, %v319_v22 }
0x1ece   :  { %v3844_v25 = vpop.eup %3843 }
0x1ecf   :  { %v2249_v9 = vmul.f32 %v3844_v25, %v2247_v27  ;;  %v2256_v13 = vsub.f32 1.0, %v3844_v25  ;;  %v2262_v38 = vmul.f32 %v3844_v25, %v4356_v42  ;;  %v1330_v25 = vsub.f32 %v4283_v47, %v4286_v50 }
0x1ed1   :  { %2251 = vrot.lane.b32.xlu1 %v2249_v9, %s3891_s19  ;;  %v1331_v27 = vmul.f32 1.442695, %v1330_v25  ;;  %v2004_v9 = vsub.f32 %v4387_v46, %v4390_v53 }
0x1f43   :  { %v2252_v28 = vpop.permute.xlu1 %2251 }
0x1f44   :  { %v2254_v31 = vadd.f32 %v2252_v28, %v2164_v36  ;;  %v2005_v28 = vmul.f32 1.442695, %v2004_v9 }
0x1f46   :  { %3845 = vtanh.f32 %v2254_v31 }
0x1f50   :  { %v3846_v32 = vpop.eup %3845 }
0x1f51   :  { %2258 = vrot.lane.b32.xlu1 %v3846_v32, %s3892_s26 }
0x1fc3   :  { %v2259_v37 = vpop.permute.xlu1 %2258 }
0x1fc4   :  { %v2261_v39 = vmul.f32 %v2259_v37, %v2256_v13 }
0x1fc6   :  { %v4408_v40 = vadd.f32 %v2262_v38, %v2261_v39 }
0x1fc8   :  { %2265 = vrot.lane.b32.xlu0 %v4408_v40, %s3892_s26 }
0x203a   :  { %v2266_v43 = vpop.permute.xlu0 %2265 }
0x203b   :  { %3450 = vmatmul.mubr.msk.f32.vlgmr.msra.gmra.mrb[20].mxu1 %vm133_vm1, %v2266_v43  ;;  %3496 = vmatmul.mubr.msk.f32.vlgmr.msra.gmra.mrb[20].mxu0 %vm133_vm1, %v2266_v43 }
0x203c   :  { %3763 = vmatpush3.bf16.msra.mxu1 %v3946_v4  ;;  %3484 = vmatprep.mubr.msk.f32.mxu1 %vm3888_vm0, %v3889_v8 }
0x203d   :  { %3764 = vmatprep.subr.bf16.mxu1 %v3887_v0  ;;  %3793 = vmatpush3.bf16.msra.mxu0 %v4078_v54 }
0x203e   :  { %3794 = vmatprep.subr.bf16.mxu0 %v3887_v0  ;;  %3506 = vmatprep.mubr.msk.f32.mxu0 %vm3888_vm0, %v3889_v8 }
0x2040   :  { %3766 = vmatpush3.bf16.msra.mxu1 %v3970_v12 }
0x2041   :  { %3767 = vmatprep.subr.bf16.mxu1 %v3887_v0  ;;  %3796 = vmatpush3.bf16.msra.mxu0 %v4084_v57 }
0x2044   :  { %3769 = vmatpush3.bf16.msra.mxu1 %v3984_v16 }
0x2045   :  { %3770 = vmatprep.subr.bf16.mxu1 %v3887_v0 }
0x2048   :  { %3772 = vmatpush3.bf16.msra.mxu1 %v4003_v20 }
0x2049   :  { %3773 = vmatprep.subr.bf16.mxu1 %v3887_v0 }
0x204c   :  { %3775 = vmatpush3.bf16.msra.mxu1 %v4015_v23  ;;  %v3885_v23 = vld [vmem:[%s4746_s2] ss:$0 sm:$0xff] }
0x204d   :  { %3776 = vmatprep.subr.bf16.mxu1 %v3887_v0 }
0x2050   :  { %3778 = vmatpush3.bf16.msra.mxu1 %v4025_v26 }
0x2051   :  { %3779 = vmatprep.subr.bf16.mxu1 %v3887_v0 }
0x2054   :  { %3781 = vmatpush3.bf16.msra.mxu1 %v4035_v29 }
0x2055   :  { %3782 = vmatprep.subr.bf16.mxu1 %v3887_v0 }
0x2058   :  { %3784 = vmatpush3.bf16.msra.mxu1 %v4045_v33 }
0x210e   :  { %v2335_v4 = vpop.f32.mrb[20].mxu1  ;;  %v2571_v8 = vpop.f32.mrb[20].mxu0 }
0x210f   :  { %v4437_v12 = vadd.f32 %v4124_v2, %v2335_v4  ;;  %v3451_v16 = vpop.f32.mrb[21].mxu1  ;;  %v3497_v20 = vpop.f32.mrb[21].mxu0  ;;  %v2572_v26 = vadd.f32 %v3885_v23, %v2571_v8 }
0x2110   :  { %v334_v16 = vshrl.u32 %v52_v30, 7 }
0x2111   :  { %2339 = vmax.xlane.f32.xlu1 %v4437_v12 }
0x2122   :  { %2583 = vrot.lane.b32.xlu1 %v2572_v26, %s3891_s19 }
0x219e   :  { %v4444_v29 = vpop.xlane.xlu1 %2339 }
0x219f   :  { %vm2416_vm0 = vcmp.ge.f32.partialorder %v4437_v12, %v4444_v29 }
0x21a0   :  { %v2417_v0 = vsel %vm2416_vm0, %v4048_v34, 128 }
0x21a1   :  { %v2419_v33 = vshra.s32 %v2417_v0, 16  ;;  %v2418_v57 = vand.u32 65535, %v2417_v0 }
0x21a2   :  { %v2584_v10 = vpop.permute.xlu1 %2583 }
0x21a3   :  { %v2421_v54 = vcvt.s32.f32 %v2419_v33  ;;  %v2420_v42 = vcvt.s32.f32 %v2418_v57 }
0x21a5   :  { %2422 = vmin.xlane.f32.xlu0 %v2421_v54 }
0x2232   :  { %v2423_v2 = vpop.xlane.xlu0 %2422 }
0x2233   :  { %vm2424_vm7 = vcmp.eq.f32.partialorder %v2421_v54, %v2423_v2  ;;  %v2429_v44 = vcvt.f32.s32 %v2423_v2 }
0x2234   :  { %v2425_v41 = vsel %vm2424_vm7, %v2420_v42, inf }
0x2235   :  { %2426 = vmin.xlane.f32.xlu0 %v2425_v41  ;;  %v2430_v49 = vshll.u32 %v2429_v44, 16 }
0x22c2   :  { %v2427_v48 = vpop.xlane.xlu0 %2426 }
0x22c3   :  { %v2428_v55 = vcvt.f32.s32 %v2427_v48 }
0x22c5   :  { %v2431_v58 = vadd.s32 %v2430_v49, %v2428_v55 }
0x22c7   :  { %vm2432_vm8 = vcmp.eq.s32.totalorder %v4048_v34, %v2431_v58 }
0x22c8   :  { %3485 = vmatmul.mubr.msk.f32.vlgmr.msra.gmra.mrb[22].mxu1 %vm2432_vm8, %v3890_v35 }
0x239b   :  { %v2501_v60 = vpop.f32.mrb[22].mxu1 }
0x239c   :  { %v2575_v61 = vadd.f32 %v2572_v26, %v2501_v60  ;;  %v3486_v63 = vpop.f32.mrb[23].mxu1 }
0x239e   :  { %v2831_v1 = vmul.f32 -1.442695, %v2575_v61 }
0x23a0   :  { %3847 = vpow2.f32 %v2831_v1 }
0x23aa   :  { %v3848_v3 = vpop.eup %3847 }
0x23ab   :  { %v2579_v5 = vadd.f32 1.0, %v3848_v3 }
0x23ad   :  { %3849 = vrcp.f32 %v2579_v5 }
0x23b7   :  { %v3850_v7 = vpop.eup %3849 }
0x23b8   :  { %v2586_v11 = vmul.f32 %v3850_v7, %v2584_v10  ;;  %v2593_v34 = vsub.f32 1.0, %v3850_v7  ;;  %v2599_v18 = vmul.f32 %v3850_v7, %v4408_v40  ;;  %v3894_v40 = vmov 1966171168  }
0x23b9   :  { %v331_v43 = vunpack.c.l.s4 %v3894_v40 }
0x23ba   :  { %2588 = vrot.lane.b32.xlu0 %v2586_v11, %s3891_s19 }
0x23bb   :  { %v332_v8 = vunpack.c.0.s8 %v331_v43  ;;  %v656_v43 = vsub.f32 %v4179_v59, %v4182_v62 }
0x23bd   :  { %v4467_v26 = vsub.s32 %v332_v8, %v334_v16  ;;  %v993_v8 = vsub.f32 %v4231_v51, %v4236_v56 }
0x23bf   :  { %v994_v16 = vmul.f32 1.442695, %v993_v8 }
0x242c   :  { %v2589_v15 = vpop.permute.xlu0 %2588 }
0x242d   :  { %v2591_v17 = vadd.f32 %v2589_v15, %v2501_v60 }
0x242f   :  { %3851 = vtanh.f32 %v2591_v17 }
0x2430   :  { %3853 = vpow2.f32 %v320_v24 }
0x2431   :  { %3855 = vpow2.f32 %v1331_v27 }
0x2432   :  { %3857 = vpow2.f32 %v2005_v28 }
0x2439   :  { %v3852_v36 = vpop.eup %3851 }
0x243a   :  { %2595 = vrot.lane.b32.xlu1 %v3852_v36, %s3892_s26  ;;  %v3854_v31 = vpop.eup %3853 }
0x243b   :  { %v3856_v32 = vpop.eup %3855 }
0x243c   :  { %v3858_v13 = vpop.eup %3857 }
0x24ac   :  { %v2596_v35 = vpop.permute.xlu1 %2595 }
0x24ad   :  { %v2598_v19 = vmul.f32 %v2596_v35, %v2593_v34 }
0x24af   :  { %v2600_v21 = vadd.f32 %v2599_v18, %v2598_v19 }
0x24b1   :  { %2602 = vrot.lane.b32.xlu1 %v2600_v21, %s3892_s26 }
0x24d5   :  { %322 = vadd.xlane.f32.xlu1 %v3854_v31 }
0x24d9   :  { %1333 = vadd.xlane.f32.xlu1 %v3856_v32 }
0x24dd   :  { %2007 = vadd.xlane.f32.xlu1 %v3858_v13 }
0x2523   :  { %v2603_v37 = vpop.permute.xlu1 %2602 }
0x2524   :  { %2754 = vst.msk [vmem:[%s4749_s7] sm:$0xff] %vm133_vm1, %v2603_v37  ;;  %3507 = vmatmul.mubr.msk.f32.vlgmr.msra.gmra.mrb[22].mxu0 %vm133_vm1, %v2603_v37 }
0x2562   :  { %v323_v38 = vpop.xlane.xlu1 %322 }
0x2563   :  { %3859 = vlog2.f32 %v323_v38 }
0x2566   :  { %v1334_v39 = vpop.xlane.xlu1 %1333 }
0x2567   :  { %3861 = vlog2.f32 %v1334_v39 }
0x256a   :  { %v2008_v4 = vpop.xlane.xlu1 %2007 }
0x256b   :  { %3863 = vlog2.f32 %v2008_v4  ;;  %v657_v4 = vmul.f32 1.442695, %v656_v43 }
0x256d   :  { %v3860_v20 = vpop.eup %3859  ;;  %3865 = vpow2.f32 %v657_v4 }
0x256e   :  { %v325_v23 = vmul.f32 0.6931472, %v3860_v20  ;;  %v1667_v20 = vsub.f32 %v4335_v45, %v4340_v52  ;;  %3867 = vpow2.f32 %v994_v16 }
0x2570   :  { %v326_v0 = vadd.f32 %v325_v23, %v4132_v14  ;;  %v1668_v23 = vmul.f32 1.442695, %v1667_v20 }
0x2571   :  { %v3862_v33 = vpop.eup %3861 }
0x2572   :  { %v327_v54 = vsub.f32 %v4127_v6, %v326_v0  ;;  %v1336_v57 = vmul.f32 0.6931472, %v3862_v33  ;;  %v2341_v0 = vsub.f32 %v4437_v12, %v4444_v29  ;;  %3869 = vpow2.f32 %v1668_v23 }
0x2574   :  { %v329_v2 = vcombine.high %v327_v54, %v327_v54  ;;  %v336_v42 = vrot.slane %v327_v54, %v4467_v26  ;;  %v1337_v41 = vadd.f32 %v1336_v57, %v4286_v50  ;;  %v3886_v54 = vld [vmem:[%s4748_s4] ss:$0 sm:$0xff] }
0x2575   :  { %v3864_v44 = vpop.eup %3863 }
0x2576   :  { %v343_v48 = vrot.slane %v329_v2, %v4467_v26  ;;  %v344_v49 = vcombine.high %v336_v42, %v336_v42  ;;  %v352_v30 = vrot.slane %v336_v42, %v4467_v26  ;;  %2770 = vst.sshfl [vmem:[%s4750_s6] sm:$0x1 pattern:$0x73625140] %v336_v42  ;;  %v1338_v14 = vsub.f32 %v4283_v47, %v1337_v41 }
0x2577   :  { %v2010_v55 = vmul.f32 0.6931472, %v3864_v44  ;;  %v2342_v42 = vmul.f32 1.442695, %v2341_v0  ;;  %v3866_v41 = vpop.eup %3865 }
0x2578   :  { %v345_v6 = vcombine.high %v343_v48, %v343_v48  ;;  %v359_v58 = vrot.slane %v343_v48, %v4467_v26  ;;  %v366_v60 = vrot.slane %v344_v49, %v4467_v26  ;;  %v374_v61 = vcombine.high %v352_v30, %v352_v30  ;;  %2771 = vst.sshfl [vmem:[%s4750_s6 + $0x8] sm:$0x1 pattern:$0x73625140] %v344_v49  ;;  %v3868_v44 = vpop.eup %3867 }
0x2579   :  { %2772 = vst.sshfl [vmem:[%s4750_s6 + $0x20] sm:$0x1 pattern:$0x73625140] %v343_v48  ;;  %v1340_v50 = vcombine.high %v1338_v14, %v1338_v14  ;;  %v1347_v63 = vrot.slane %v1338_v14, %v4467_v26  ;;  %v2011_v47 = vadd.f32 %v2010_v55, %v4390_v53  ;;  %3871 = vpow2.f32 %v2342_v42 }
0x257a   :  { %v373_v1 = vrot.slane %v345_v6, %v4467_v26  ;;  %v375_v3 = vcombine.high %v359_v58, %v359_v58  ;;  %v376_v5 = vcombine.high %v366_v60, %v366_v60  ;;  %388 = vst [vmem:[%s4750_s6 + $0x10] sm:$0x1] %v374_v61  ;;  %2773 = vst.sshfl [vmem:[%s4750_s6 + $0x28] sm:$0x1 pattern:$0x73625140] %v345_v6 }
0x257b   :  { %v1354_v7 = vrot.slane %v1340_v50, %v4467_v26  ;;  %v1355_v10 = vcombine.high %v1347_v63, %v1347_v63  ;;  %v1363_v11 = vrot.slane %v1347_v63, %v4467_v26  ;;  %2797 = vst.sshfl [vmem:[%s4750_s6 + $0x3] sm:$0x1 pattern:$0x73625140] %v1347_v63  ;;  %v2012_v53 = vsub.f32 %v4387_v46, %v2011_v47 }
0x257c   :  { %v377_v15 = vcombine.high %v373_v1, %v373_v1  ;;  %389 = vst [vmem:[%s4750_s6 + $0x18] sm:$0x1] %v376_v5  ;;  %392 = vst [vmem:[%s4750_s6 + $0x30] sm:$0x1] %v375_v3  ;;  %v3870_v48 = vpop.eup %3869 }
0x257d   :  { %v1356_v17 = vcombine.high %v1354_v7, %v1354_v7  ;;  %v1370_v36 = vrot.slane %v1354_v7, %v4467_v26  ;;  %v1377_v34 = vrot.slane %v1355_v10, %v4467_v26  ;;  %v1385_v35 = vcombine.high %v1363_v11, %v1363_v11  ;;  %2798 = vst.sshfl [vmem:[%s4750_s6 + $0xb] sm:$0x1 pattern:$0x73625140] %v1355_v10 }
0x257e   :  { %2799 = vst.sshfl [vmem:[%s4750_s6 + $0x23] sm:$0x1 pattern:$0x73625140] %v1354_v7  ;;  %393 = vst [vmem:[%s4750_s6 + $0x38] sm:$0x1] %v377_v15  ;;  %v2014_v46 = vcombine.high %v2012_v53, %v2012_v53  ;;  %v2021_v18 = vrot.slane %v2012_v53, %v4467_v26 }
0x257f   :  { %v1384_v19 = vrot.slane %v1356_v17, %v4467_v26  ;;  %v1386_v21 = vcombine.high %v1370_v36, %v1370_v36  ;;  %v1387_v22 = vcombine.high %v1377_v34, %v1377_v34  ;;  %1399 = vst [vmem:[%s4750_s6 + $0x13] sm:$0x1] %v1385_v35  ;;  %2800 = vst.sshfl [vmem:[%s4750_s6 + $0x2b] sm:$0x1 pattern:$0x73625140] %v1356_v17 }
0x2580   :  { %v2028_v24 = vrot.slane %v2014_v46, %v4467_v26  ;;  %v2029_v25 = vcombine.high %v2021_v18, %v2021_v18  ;;  %v2037_v27 = vrot.slane %v2021_v18, %v4467_v26  ;;  %2815 = vst.sshfl [vmem:[%s4750_s6 + $0x5] sm:$0x1 pattern:$0x73625140] %v2021_v18 }
0x2581   :  { %v1388_v9 = vcombine.high %v1384_v19, %v1384_v19  ;;  %1400 = vst [vmem:[%s4750_s6 + $0x1b] sm:$0x1] %v1387_v22  ;;  %1403 = vst [vmem:[%s4750_s6 + $0x33] sm:$0x1] %v1386_v21 }
0x2582   :  { %v2030_v28 = vcombine.high %v2028_v24, %v2028_v24  ;;  %v2044_v31 = vrot.slane %v2028_v24, %v4467_v26  ;;  %v2051_v32 = vrot.slane %v2029_v25, %v4467_v26  ;;  %v2059_v13 = vcombine.high %v2037_v27, %v2037_v27  ;;  %2816 = vst.sshfl [vmem:[%s4750_s6 + $0xd] sm:$0x1 pattern:$0x73625140] %v2029_v25 }
0x2583   :  { %2817 = vst.sshfl [vmem:[%s4750_s6 + $0x25] sm:$0x1 pattern:$0x73625140] %v2028_v24  ;;  %1404 = vst [vmem:[%s4750_s6 + $0x3b] sm:$0x1] %v1388_v9  ;;  %v3872_v49 = vpop.eup %3871 }
0x2584   :  { %v2058_v37 = vrot.slane %v2030_v28, %v4467_v26  ;;  %v2060_v38 = vcombine.high %v2044_v31, %v2044_v31  ;;  %v2061_v39 = vcombine.high %v2051_v32, %v2051_v32  ;;  %2073 = vst [vmem:[%s4750_s6 + $0x15] sm:$0x1] %v2059_v13  ;;  %2818 = vst.sshfl [vmem:[%s4750_s6 + $0x2d] sm:$0x1 pattern:$0x73625140] %v2030_v28 }
0x2586   :  { %v2062_v40 = vcombine.high %v2058_v37, %v2058_v37  ;;  %2074 = vst [vmem:[%s4750_s6 + $0x1d] sm:$0x1] %v2061_v39  ;;  %2077 = vst [vmem:[%s4750_s6 + $0x35] sm:$0x1] %v2060_v38 }
0x2588   :  { %2078 = vst [vmem:[%s4750_s6 + $0x3d] sm:$0x1] %v2062_v40 }
0x25f7   :  { %v2672_v33 = vpop.f32.mrb[22].mxu0 }
0x25f8   :  { %v4576_v57 = vadd.f32 %v3886_v54, %v2672_v33  ;;  %v3508_v2 = vpop.f32.mrb[23].mxu0 }
0x25fa   :  { %2676 = vmax.xlane.f32.xlu0 %v4576_v57 }
0x25fe   :  { %659 = vadd.xlane.f32.xlu0 %v3866_v41 }
0x2602   :  { %996 = vadd.xlane.f32.xlu0 %v3868_v44 }
0x2606   :  { %1670 = vadd.xlane.f32.xlu0 %v3870_v48 }
0x260a   :  { %2344 = vadd.xlane.f32.xlu0 %v3872_v49 }
0x2687   :  { %v4579_v30 = vpop.xlane.xlu0 %2676 }
0x2688   :  { %v2678_v14 = vsub.f32 %v4576_v57, %v4579_v30 }
0x268a   :  { %v2679_v55 = vmul.f32 1.442695, %v2678_v14 }
0x268b   :  { %v660_v6 = vpop.xlane.xlu0 %659 }
0x268c   :  { %3873 = vpow2.f32 %v2679_v55 }
0x268d   :  { %3875 = vlog2.f32 %v660_v6 }
0x268f   :  { %v997_v58 = vpop.xlane.xlu0 %996 }
0x2690   :  { %3877 = vlog2.f32 %v997_v58 }
0x2693   :  { %v1671_v60 = vpop.xlane.xlu0 %1670 }
0x2694   :  { %3879 = vlog2.f32 %v1671_v60 }
0x2696   :  { %v3874_v61 = vpop.eup %3873 }
0x2697   :  { %v3876_v50 = vpop.eup %3875  ;;  %2681 = vadd.xlane.f32.xlu1 %v3874_v61  ;;  %v2345_v63 = vpop.xlane.xlu0 %2344 }
0x2698   :  { %v662_v47 = vmul.f32 0.6931472, %v3876_v50  ;;  %3881 = vlog2.f32 %v2345_v63 }
0x269a   :  { %v3878_v1 = vpop.eup %3877  ;;  %v663_v3 = vadd.f32 %v662_v47, %v4182_v62 }
0x269b   :  { %v999_v5 = vmul.f32 0.6931472, %v3878_v1 }
0x269c   :  { %v664_v7 = vsub.f32 %v4179_v59, %v663_v3 }
0x269d   :  { %v1000_v10 = vadd.f32 %v999_v5, %v4236_v56 }
0x269e   :  { %v3880_v11 = vpop.eup %3879  ;;  %v666_v53 = vcombine.high %v664_v7, %v664_v7  ;;  %v673_v15 = vrot.slane %v664_v7, %v4467_v26 }
0x269f   :  { %v1001_v17 = vsub.f32 %v4231_v51, %v1000_v10  ;;  %v1673_v36 = vmul.f32 0.6931472, %v3880_v11 }
0x26a0   :  { %v680_v34 = vrot.slane %v666_v53, %v4467_v26  ;;  %v681_v35 = vcombine.high %v673_v15, %v673_v15  ;;  %v689_v46 = vrot.slane %v673_v15, %v4467_v26  ;;  %2779 = vst.sshfl [vmem:[%s4750_s6 + $0x1] sm:$0x1 pattern:$0x73625140] %v673_v15 }
0x26a1   :  { %v1003_v62 = vcombine.high %v1001_v17, %v1001_v17  ;;  %v1010_v59 = vrot.slane %v1001_v17, %v4467_v26  ;;  %v1674_v56 = vadd.f32 %v1673_v36, %v4340_v52 }
0x26a2   :  { %v3882_v18 = vpop.eup %3881  ;;  %v682_v19 = vcombine.high %v680_v34, %v680_v34  ;;  %v696_v21 = vrot.slane %v680_v34, %v4467_v26  ;;  %v703_v51 = vrot.slane %v681_v35, %v4467_v26  ;;  %v711_v22 = vcombine.high %v689_v46, %v689_v46  ;;  %2780 = vst.sshfl [vmem:[%s4750_s6 + $0x9] sm:$0x1 pattern:$0x73625140] %v681_v35 }
0x26a3   :  { %2781 = vst.sshfl [vmem:[%s4750_s6 + $0x21] sm:$0x1 pattern:$0x73625140] %v680_v34  ;;  %v1017_v24 = vrot.slane %v1003_v62, %v4467_v26  ;;  %v1018_v25 = vcombine.high %v1010_v59, %v1010_v59  ;;  %v1026_v52 = vrot.slane %v1010_v59, %v4467_v26  ;;  %v1675_v27 = vsub.f32 %v4335_v45, %v1674_v56 }
0x26a4   :  { %2788 = vst.sshfl [vmem:[%s4750_s6 + $0x2] sm:$0x1 pattern:$0x73625140] %v1010_v59  ;;  %v710_v9 = vrot.slane %v682_v19, %v4467_v26  ;;  %v712_v28 = vcombine.high %v696_v21, %v696_v21  ;;  %v713_v31 = vcombine.high %v703_v51, %v703_v51  ;;  %725 = vst [vmem:[%s4750_s6 + $0x11] sm:$0x1] %v711_v22 }
0x26a5   :  { %2782 = vst.sshfl [vmem:[%s4750_s6 + $0x29] sm:$0x1 pattern:$0x73625140] %v682_v19  ;;  %v2347_v32 = vmul.f32 0.6931472, %v3882_v18  ;;  %v1019_v13 = vcombine.high %v1017_v24, %v1017_v24  ;;  %v1033_v37 = vrot.slane %v1017_v24, %v4467_v26  ;;  %v1040_v38 = vrot.slane %v1018_v25, %v4467_v26 }
0x26a6   :  { %v1048_v39 = vcombine.high %v1026_v52, %v1026_v52  ;;  %2789 = vst.sshfl [vmem:[%s4750_s6 + $0xa] sm:$0x1 pattern:$0x73625140] %v1018_v25  ;;  %v714_v45 = vcombine.high %v710_v9, %v710_v9  ;;  %726 = vst [vmem:[%s4750_s6 + $0x19] sm:$0x1] %v713_v31  ;;  %v1677_v40 = vcombine.high %v1675_v27, %v1675_v27 }
0x26a7   :  { %2790 = vst.sshfl [vmem:[%s4750_s6 + $0x22] sm:$0x1 pattern:$0x73625140] %v1017_v24  ;;  %729 = vst [vmem:[%s4750_s6 + $0x31] sm:$0x1] %v712_v28  ;;  %v1684_v43 = vrot.slane %v1675_v27, %v4467_v26  ;;  %v2348_v4 = vadd.f32 %v2347_v32, %v4444_v29  ;;  %v1047_v8 = vrot.slane %v1019_v13, %v4467_v26 }
0x26a8   :  { %v1049_v16 = vcombine.high %v1033_v37, %v1033_v37  ;;  %v1050_v20 = vcombine.high %v1040_v38, %v1040_v38  ;;  %1062 = vst [vmem:[%s4750_s6 + $0x12] sm:$0x1] %v1048_v39  ;;  %2791 = vst.sshfl [vmem:[%s4750_s6 + $0x2a] sm:$0x1 pattern:$0x73625140] %v1019_v13  ;;  %v1691_v23 = vrot.slane %v1677_v40, %v4467_v26 }
0x26a9   :  { %730 = vst [vmem:[%s4750_s6 + $0x39] sm:$0x1] %v714_v45  ;;  %v1692_v0 = vcombine.high %v1684_v43, %v1684_v43  ;;  %v1700_v29 = vrot.slane %v1684_v43, %v4467_v26  ;;  %2806 = vst.sshfl [vmem:[%s4750_s6 + $0x4] sm:$0x1 pattern:$0x73625140] %v1684_v43  ;;  %v2349_v33 = vsub.f32 %v4437_v12, %v2348_v4 }
0x26aa   :  { %v1051_v54 = vcombine.high %v1047_v8, %v1047_v8  ;;  %1063 = vst [vmem:[%s4750_s6 + $0x1a] sm:$0x1] %v1050_v20  ;;  %1066 = vst [vmem:[%s4750_s6 + $0x32] sm:$0x1] %v1049_v16  ;;  %v1693_v2 = vcombine.high %v1691_v23, %v1691_v23  ;;  %v1707_v42 = vrot.slane %v1691_v23, %v4467_v26 }
0x26ab   :  { %v1714_v41 = vrot.slane %v1692_v0, %v4467_v26  ;;  %v1722_v44 = vcombine.high %v1700_v29, %v1700_v29  ;;  %2807 = vst.sshfl [vmem:[%s4750_s6 + $0xc] sm:$0x1 pattern:$0x73625140] %v1692_v0  ;;  %v2351_v12 = vcombine.high %v2349_v33, %v2349_v33  ;;  %v2358_v48 = vrot.slane %v2349_v33, %v4467_v26 }
0x26ac   :  { %2808 = vst.sshfl [vmem:[%s4750_s6 + $0x24] sm:$0x1 pattern:$0x73625140] %v1691_v23  ;;  %1067 = vst [vmem:[%s4750_s6 + $0x3a] sm:$0x1] %v1051_v54  ;;  %v1721_v49 = vrot.slane %v1693_v2, %v4467_v26  ;;  %v1723_v14 = vcombine.high %v1707_v42, %v1707_v42 }
0x26ad   :  { %v1724_v55 = vcombine.high %v1714_v41, %v1714_v41  ;;  %1736 = vst [vmem:[%s4750_s6 + $0x14] sm:$0x1] %v1722_v44  ;;  %2809 = vst.sshfl [vmem:[%s4750_s6 + $0x2c] sm:$0x1 pattern:$0x73625140] %v1693_v2  ;;  %v2365_v6 = vrot.slane %v2351_v12, %v4467_v26  ;;  %v2366_v58 = vcombine.high %v2358_v48, %v2358_v48 }
0x26ae   :  { %v2374_v60 = vrot.slane %v2358_v48, %v4467_v26  ;;  %2824 = vst.sshfl [vmem:[%s4750_s6 + $0x6] sm:$0x1 pattern:$0x73625140] %v2358_v48  ;;  %v1725_v61 = vcombine.high %v1721_v49, %v1721_v49  ;;  %1740 = vst [vmem:[%s4750_s6 + $0x34] sm:$0x1] %v1723_v14 }
0x26af   :  { %1737 = vst [vmem:[%s4750_s6 + $0x1c] sm:$0x1] %v1724_v55  ;;  %v2367_v50 = vcombine.high %v2365_v6, %v2365_v6  ;;  %v2381_v63 = vrot.slane %v2365_v6, %v4467_v26  ;;  %v2388_v47 = vrot.slane %v2366_v58, %v4467_v26  ;;  %2825 = vst.sshfl [vmem:[%s4750_s6 + $0xe] sm:$0x1 pattern:$0x73625140] %v2366_v58 }
0x26b0   :  { %v2396_v1 = vcombine.high %v2374_v60, %v2374_v60  ;;  %2826 = vst.sshfl [vmem:[%s4750_s6 + $0x26] sm:$0x1 pattern:$0x73625140] %v2365_v6  ;;  %1741 = vst [vmem:[%s4750_s6 + $0x3c] sm:$0x1] %v1725_v61 }
0x26b1   :  { %v2395_v3 = vrot.slane %v2367_v50, %v4467_v26  ;;  %v2397_v5 = vcombine.high %v2381_v63, %v2381_v63  ;;  %v2398_v7 = vcombine.high %v2388_v47, %v2388_v47  ;;  %2827 = vst.sshfl [vmem:[%s4750_s6 + $0x2e] sm:$0x1 pattern:$0x73625140] %v2367_v50 }
0x26b2   :  { %2410 = vst [vmem:[%s4750_s6 + $0x16] sm:$0x1] %v2396_v1 }
0x26b3   :  { %v2399_v10 = vcombine.high %v2395_v3, %v2395_v3  ;;  %2411 = vst [vmem:[%s4750_s6 + $0x1e] sm:$0x1] %v2398_v7  ;;  %2414 = vst [vmem:[%s4750_s6 + $0x36] sm:$0x1] %v2397_v5 }
0x26b5   :  { %2415 = vst [vmem:[%s4750_s6 + $0x3e] sm:$0x1] %v2399_v10 }
0x2724   :  { %v2682_v11 = vpop.xlane.xlu1 %2681 }
0x2725   :  { %3883 = vlog2.f32 %v2682_v11 }
0x272f   :  { %v3884_v53 = vpop.eup %3883 }
0x2730   :  { %v2684_v15 = vmul.f32 0.6931472, %v3884_v53 }
0x2732   :  { %v2685_v17 = vadd.f32 %v2684_v15, %v4579_v30 }
0x2734   :  { %v2686_v36 = vsub.f32 %v4576_v57, %v2685_v17 }
0x2736   :  { %v2688_v34 = vcombine.high %v2686_v36, %v2686_v36  ;;  %v2695_v35 = vrot.slane %v2686_v36, %v4467_v26 }
0x2738   :  { %v2702_v46 = vrot.slane %v2688_v34, %v4467_v26  ;;  %v2703_v62 = vcombine.high %v2695_v35, %v2695_v35  ;;  %v2711_v59 = vrot.slane %v2695_v35, %v4467_v26  ;;  %2833 = vst.sshfl [vmem:[%s4750_s6 + $0x7] sm:$0x1 pattern:$0x73625140] %v2695_v35 }
0x273a   :  { %v2704_v56 = vcombine.high %v2702_v46, %v2702_v46  ;;  %v2718_v18 = vrot.slane %v2702_v46, %v4467_v26  ;;  %v2725_v19 = vrot.slane %v2703_v62, %v4467_v26  ;;  %v2733_v30 = vcombine.high %v2711_v59, %v2711_v59  ;;  %2834 = vst.sshfl [vmem:[%s4750_s6 + $0xf] sm:$0x1 pattern:$0x73625140] %v2703_v62 }
0x273b   :  { %2835 = vst.sshfl [vmem:[%s4750_s6 + $0x27] sm:$0x1 pattern:$0x73625140] %v2702_v46 }
0x273c   :  { %v2732_v57 = vrot.slane %v2704_v56, %v4467_v26  ;;  %v2734_v21 = vcombine.high %v2718_v18, %v2718_v18  ;;  %v2735_v51 = vcombine.high %v2725_v19, %v2725_v19  ;;  %2747 = vst [vmem:[%s4750_s6 + $0x17] sm:$0x1] %v2733_v30  ;;  %2836 = vst.sshfl [vmem:[%s4750_s6 + $0x2f] sm:$0x1 pattern:$0x73625140] %v2704_v56 }
0x273e   :  { %v2736_v22 = vcombine.high %v2732_v57, %v2732_v57  ;;  %2748 = vst [vmem:[%s4750_s6 + $0x1f] sm:$0x1] %v2735_v51  ;;  %2751 = vst [vmem:[%s4750_s6 + $0x37] sm:$0x1] %v2734_v21 }
0x2740   :  { %2752 = vst [vmem:[%s4750_s6 + $0x3f] sm:$0x1] %v2736_v22 }

</bundles_post_ra>
